<compile_context>
chip_gen: v6e
topology: v6e:2x2x1
jax: 0.10.0
libtpu: 0.0.40
codegen_flags: <defaults>
</compile_context>

<pallas_src>
import jax
import jax.numpy as jnp
from jax import lax
from jax.experimental import pallas as pl
from jax.experimental.pallas import tpu as pltpu


def make_lstm_kernel(T, B, H):
    def kernel(x_ref, wih_ref, whh_ref, b_ref, wdec_ref, bdec_ref,
               out_ref, preact_ref):
        # ---- hoisted input projection: one bf16 matmul for all timesteps ---
        # x_ref: (T*B, E) bf16, wih_ref: (E, 4H) bf16, b_ref: (1, 4H) f32.
        # Stage into VMEM scratch so the recurrence reads (B, 4H) slices
        # instead of keeping a (T*B, 4H) f32 value live across the loop.
        preact_ref[...] = (
            jnp.dot(x_ref[...], wih_ref[...],
                    preferred_element_type=jnp.float32)
            + b_ref[...])

        def sigmoid(x):
            # sigmoid(x) = 0.5*tanh(0.5*x) + 0.5 : one EUP push per call.
            return 0.5 * jnp.tanh(0.5 * x) + 0.5

        def step(t, carry):
            h, c = carry
            idx = pl.multiple_of(t * B, B)           # sublane-aligned start
            gates = (preact_ref[pl.ds(idx, B), :]
                     + jnp.dot(h.astype(jnp.bfloat16), whh_ref[...],
                               preferred_element_type=jnp.float32))
            i_g = sigmoid(gates[:, 0 * H:1 * H])
            f_g = sigmoid(gates[:, 1 * H:2 * H])
            g_g = jnp.tanh(gates[:, 2 * H:3 * H])
            o_g = sigmoid(gates[:, 3 * H:4 * H])
            c = f_g * c + i_g * g_g
            h = o_g * jnp.tanh(c)
            return h, c

        h0 = jnp.zeros((B, H), jnp.float32)
        c0 = jnp.zeros((B, H), jnp.float32)
        h, _ = lax.fori_loop(0, T, step, (h0, c0), unroll=True)

        # ---- fused decoder on the last hidden state (lane-dense output) ----
        logits = (jnp.dot(h.astype(jnp.bfloat16), wdec_ref[...],
                          preferred_element_type=jnp.float32)
                  + bdec_ref[...])                   # (B, C_pad)
        out_ref[...] = logits.astype(out_ref.dtype)

    return kernel


def lstm_forward(x_btE, w_ih, w_hh, b_ih, b_hh, w_dec, b_dec):
    """x_btE: (B, T, E) batch-first, like the PyTorch module.

    w_ih: (E, 4H) = torch W_ih^T, w_hh: (H, 4H) = torch W_hh^T,
    b_ih/b_hh: (4H,), w_dec: (H, C) = torch decoder.weight^T, b_dec: (C,).
    """
    B, T, E = x_btE.shape
    H = w_hh.shape[0]
    C = w_dec.shape[1]
    LANE = 128
    C_pad = ((C + LANE - 1) // LANE) * LANE

    # time-major, flattened so the x-projection is one (T*B, E) matmul.
    # Matmul operands are pre-cast to bf16; biases / accumulation stay f32.
    x_flat = (jnp.transpose(x_btE, (1, 0, 2))
              .reshape(T * B, E).astype(jnp.bfloat16))
    w_ih_b = w_ih.astype(jnp.bfloat16)
    w_hh_b = w_hh.astype(jnp.bfloat16)
    b = (b_ih + b_hh).reshape(1, 4 * H).astype(jnp.float32)
    # lane-dense (zero-padded) decoder
    w_dec_p = (jnp.zeros((H, C_pad), jnp.float32)
               .at[:, :C].set(w_dec).astype(jnp.bfloat16))
    b_dec_p = jnp.zeros((1, C_pad), jnp.float32).at[0, :C].set(b_dec)

    vmem = pl.BlockSpec(memory_space=pltpu.MemorySpace.VMEM)

    out = pl.pallas_call(
        make_lstm_kernel(T, B, H),
        out_shape=jax.ShapeDtypeStruct((B, C_pad), jnp.float32),
        in_specs=[vmem] * 6,
        out_specs=vmem,
        scratch_shapes=[pltpu.VMEM((T * B, 4 * H), jnp.float32)],
    )(x_flat, w_ih_b, w_hh_b, b, w_dec_p, b_dec_p)

    return out[:, :C]


def lstm_forward_ref(x_btE, w_ih, w_hh, b_ih, b_hh, w_dec, b_dec):
    """Pure-JAX f32 reference matching torch.nn.LSTM(batch_first=True) + Linear."""
    B, T, E = x_btE.shape
    H = w_hh.shape[0]
    h = jnp.zeros((B, H), jnp.float32)
    c = jnp.zeros((B, H), jnp.float32)
    for t in range(T):
        g = x_btE[:, t, :] @ w_ih + h @ w_hh + b_ih + b_hh
        i = jax.nn.sigmoid(g[:, 0 * H:1 * H])
        f = jax.nn.sigmoid(g[:, 1 * H:2 * H])
        gg = jnp.tanh(g[:, 2 * H:3 * H])
        o = jax.nn.sigmoid(g[:, 3 * H:4 * H])
        c = f * c + i * gg
        h = o * jnp.tanh(c)
    return h @ w_dec + b_dec


if __name__ == "__main__":
    # small shapes consistent with the module's forward:
    # X: (batch, seq, embed_dim); hidden_dim H; num_classes C
    B, T, E, H, C = 8, 8, 32, 128, 8

    key = jax.random.PRNGKey(0)
    kx, k1, k2, k3, k4, k5, k6 = jax.random.split(key, 7)

    x = jax.random.normal(kx, (B, T, E), dtype=jnp.float32)

    # deterministic synthetic parameters (transposed to right-multiply form)
    s = 0.1
    w_ih = s * jax.random.normal(k1, (E, 4 * H), dtype=jnp.float32)   # = W_ih^T
    w_hh = s * jax.random.normal(k2, (H, 4 * H), dtype=jnp.float32)   # = W_hh^T
    b_ih = s * jax.random.normal(k3, (4 * H,), dtype=jnp.float32)
    b_hh = s * jax.random.normal(k4, (4 * H,), dtype=jnp.float32)
    # decoder: xavier_uniform_ on (C, H) weight -> stored transposed (H, C)
    limit = (6.0 / (H + C)) ** 0.5
    w_dec = jax.random.uniform(k5, (H, C), dtype=jnp.float32,
                               minval=-limit, maxval=limit)
    b_dec = s * jax.random.normal(k6, (C,), dtype=jnp.float32)

    out = lstm_forward(x, w_ih, w_hh, b_ih, b_hh, w_dec, b_dec)
    out = jax.block_until_ready(out)

    ref = lstm_forward_ref(x, w_ih, w_hh, b_ih, b_hh, w_dec, b_dec)
    assert out.shape == (B, C)
    # bf16 matmul operands (single MXU pass) compound rounding over T steps,
    # so the tolerance vs. the full-f32 reference is loosened.
    assert jnp.allclose(out, ref, atol=5e-2, rtol=5e-2), "mismatch vs reference"

    print("KERNEL_OK")
</pallas_src>

<mosaic_0001>
module attributes {stable_mosaic.version = 11 : i64} {
  func.func @kernel(%arg0: memref<64x32xbf16, #tpu.memory_space<vmem>>, %arg1: memref<32x512xbf16, #tpu.memory_space<vmem>>, %arg2: memref<128x512xbf16, #tpu.memory_space<vmem>>, %arg3: memref<1x512xf32, #tpu.memory_space<vmem>>, %arg4: memref<128x128xbf16, #tpu.memory_space<vmem>>, %arg5: memref<1x128xf32, #tpu.memory_space<vmem>>, %arg6: memref<8x128xf32, #tpu.memory_space<vmem>>, %arg7: memref<64x512xf32, #tpu.memory_space<vmem>>) attributes {dimension_semantics = [], scalar_prefetch = 0 : i64, scratch_operands = 1 : i64, tpu.core_type = #tpu.core_type<tc>} {
    %c0 = arith.constant 0 : index
    %c0_0 = arith.constant 0 : index
    %0 = vector.load %arg0[%c0, %c0_0] : memref<64x32xbf16, #tpu.memory_space<vmem>>, vector<64x32xbf16>
    %c0_1 = arith.constant 0 : index
    %c0_2 = arith.constant 0 : index
    %1 = vector.load %arg1[%c0_1, %c0_2] : memref<32x512xbf16, #tpu.memory_space<vmem>>, vector<32x512xbf16>
    %cst = arith.constant dense<0.000000e+00> : vector<64x512xf32>
    %2 = tpu.matmul %0, %1, %cst {dimension_numbers = #tpu.dot_dimension_numbers<[1], [0], [0], [1], [0, 0, 1, 1], [], []>} : vector<64x32xbf16>, vector<32x512xbf16>, vector<64x512xf32> -> vector<64x512xf32>
    %c0_3 = arith.constant 0 : index
    %c0_4 = arith.constant 0 : index
    %3 = vector.load %arg3[%c0_3, %c0_4] : memref<1x512xf32, #tpu.memory_space<vmem>>, vector<1x512xf32>
    %4 = vector.broadcast %3 : vector<1x512xf32> to vector<64x512xf32>
    %5 = arith.addf %2, %4 : vector<64x512xf32>
    %c0_5 = arith.constant 0 : index
    %c0_6 = arith.constant 0 : index
    %6 = vector.load %arg7[%c0_5, %c0_6] : memref<64x512xf32, #tpu.memory_space<vmem>>, vector<64x512xf32>
    tpu.vector_store %arg7[%c0_5, %c0_6], %5 {strides = array<i32>} : memref<64x512xf32, #tpu.memory_space<vmem>>, vector<64x512xf32>,
    %cst_7 = arith.constant 0.000000e+00 : f32
    %7 = vector.broadcast %cst_7 : f32 to vector<8x128xf32>
    %cst_8 = arith.constant 0.000000e+00 : f32
    %8 = vector.broadcast %cst_8 : f32 to vector<8x128xf32>
    %c0_i32 = arith.constant 0 : i32
    %c8_i32 = arith.constant 8 : i32
    %9 = arith.muli %c0_i32, %c8_i32 : i32
    %10 = tpu.assume_multiple %9, 8 : i32
    %11 = arith.index_cast %10 : i32 to index
    %c0_9 = arith.constant 0 : index
    %12 = vector.load %arg7[%11, %c0_9] : memref<64x512xf32, #tpu.memory_space<vmem>>, vector<8x512xf32>
    %13 = arith.truncf %7 : vector<8x128xf32> to vector<8x128xbf16>
    %c0_10 = arith.constant 0 : index
    %c0_11 = arith.constant 0 : index
    %14 = vector.load %arg2[%c0_10, %c0_11] : memref<128x512xbf16, #tpu.memory_space<vmem>>, vector<128x512xbf16>
    %cst_12 = arith.constant dense<0.000000e+00> : vector<8x512xf32>
    %15 = tpu.matmul %13, %14, %cst_12 {dimension_numbers = #tpu.dot_dimension_numbers<[1], [0], [0], [1], [0, 0, 1, 1], [], []>} : vector<8x128xbf16>, vector<128x512xbf16>, vector<8x512xf32> -> vector<8x512xf32>
    %16 = arith.addf %12, %15 : vector<8x512xf32>
    %17 = vector.extract_strided_slice %16 {offsets = [0, 0], sizes = [8, 128], strides = [1, 1]} : vector<8x512xf32> to vector<8x128xf32>
    %cst_13 = arith.constant 5.000000e-01 : f32
    %18 = vector.broadcast %cst_13 : f32 to vector<8x128xf32>
    %19 = arith.mulf %18, %17 : vector<8x128xf32>
    %20 = math.tanh %19 : vector<8x128xf32>
    %cst_14 = arith.constant 5.000000e-01 : f32
    %21 = vector.broadcast %cst_14 : f32 to vector<8x128xf32>
    %22 = arith.mulf %21, %20 : vector<8x128xf32>
    %cst_15 = arith.constant 5.000000e-01 : f32
    %23 = vector.broadcast %cst_15 : f32 to vector<8x128xf32>
    %24 = arith.addf %22, %23 : vector<8x128xf32>
    %25 = vector.extract_strided_slice %16 {offsets = [0, 128], sizes = [8, 128], strides = [1, 1]} : vector<8x512xf32> to vector<8x128xf32>
    %cst_16 = arith.constant 5.000000e-01 : f32
    %26 = vector.broadcast %cst_16 : f32 to vector<8x128xf32>
    %27 = arith.mulf %26, %25 : vector<8x128xf32>
    %28 = math.tanh %27 : vector<8x128xf32>
    %cst_17 = arith.constant 5.000000e-01 : f32
    %29 = vector.broadcast %cst_17 : f32 to vector<8x128xf32>
    %30 = arith.mulf %29, %28 : vector<8x128xf32>
    %cst_18 = arith.constant 5.000000e-01 : f32
    %31 = vector.broadcast %cst_18 : f32 to vector<8x128xf32>
    %32 = arith.addf %30, %31 : vector<8x128xf32>
    %33 = vector.extract_strided_slice %16 {offsets = [0, 256], sizes = [8, 128], strides = [1, 1]} : vector<8x512xf32> to vector<8x128xf32>
    %34 = math.tanh %33 : vector<8x128xf32>
    %35 = vector.extract_strided_slice %16 {offsets = [0, 384], sizes = [8, 128], strides = [1, 1]} : vector<8x512xf32> to vector<8x128xf32>
    %cst_19 = arith.constant 5.000000e-01 : f32
    %36 = vector.broadcast %cst_19 : f32 to vector<8x128xf32>
    %37 = arith.mulf %36, %35 : vector<8x128xf32>
    %38 = math.tanh %37 : vector<8x128xf32>
    %cst_20 = arith.constant 5.000000e-01 : f32
    %39 = vector.broadcast %cst_20 : f32 to vector<8x128xf32>
    %40 = arith.mulf %39, %38 : vector<8x128xf32>
    %cst_21 = arith.constant 5.000000e-01 : f32
    %41 = vector.broadcast %cst_21 : f32 to vector<8x128xf32>
    %42 = arith.addf %40, %41 : vector<8x128xf32>
    %43 = arith.mulf %32, %8 : vector<8x128xf32>
    %44 = arith.mulf %24, %34 : vector<8x128xf32>
    %45 = arith.addf %43, %44 : vector<8x128xf32>
    %46 = math.tanh %45 : vector<8x128xf32>
    %47 = arith.mulf %42, %46 : vector<8x128xf32>
    %c1_i32 = arith.constant 1 : i32
    %c8_i32_22 = arith.constant 8 : i32
    %48 = arith.muli %c1_i32, %c8_i32_22 : i32
    %49 = tpu.assume_multiple %48, 8 : i32
    %50 = arith.index_cast %49 : i32 to index
    %c0_23 = arith.constant 0 : index
    %51 = vector.load %arg7[%50, %c0_23] : memref<64x512xf32, #tpu.memory_space<vmem>>, vector<8x512xf32>
    %52 = arith.truncf %47 : vector<8x128xf32> to vector<8x128xbf16>
    %c0_24 = arith.constant 0 : index
    %c0_25 = arith.constant 0 : index
    %53 = vector.load %arg2[%c0_24, %c0_25] : memref<128x512xbf16, #tpu.memory_space<vmem>>, vector<128x512xbf16>
    %cst_26 = arith.constant dense<0.000000e+00> : vector<8x512xf32>
    %54 = tpu.matmul %52, %53, %cst_26 {dimension_numbers = #tpu.dot_dimension_numbers<[1], [0], [0], [1], [0, 0, 1, 1], [], []>} : vector<8x128xbf16>, vector<128x512xbf16>, vector<8x512xf32> -> vector<8x512xf32>
    %55 = arith.addf %51, %54 : vector<8x512xf32>
    %56 = vector.extract_strided_slice %55 {offsets = [0, 0], sizes = [8, 128], strides = [1, 1]} : vector<8x512xf32> to vector<8x128xf32>
    %cst_27 = arith.constant 5.000000e-01 : f32
    %57 = vector.broadcast %cst_27 : f32 to vector<8x128xf32>
    %58 = arith.mulf %57, %56 : vector<8x128xf32>
    %59 = math.tanh %58 : vector<8x128xf32>
    %cst_28 = arith.constant 5.000000e-01 : f32
    %60 = vector.broadcast %cst_28 : f32 to vector<8x128xf32>
    %61 = arith.mulf %60, %59 : vector<8x128xf32>
    %cst_29 = arith.constant 5.000000e-01 : f32
    %62 = vector.broadcast %cst_29 : f32 to vector<8x128xf32>
    %63 = arith.addf %61, %62 : vector<8x128xf32>
    %64 = vector.extract_strided_slice %55 {offsets = [0, 128], sizes = [8, 128], strides = [1, 1]} : vector<8x512xf32> to vector<8x128xf32>
    %cst_30 = arith.constant 5.000000e-01 : f32
    %65 = vector.broadcast %cst_30 : f32 to vector<8x128xf32>
    %66 = arith.mulf %65, %64 : vector<8x128xf32>
    %67 = math.tanh %66 : vector<8x128xf32>
    %cst_31 = arith.constant 5.000000e-01 : f32
    %68 = vector.broadcast %cst_31 : f32 to vector<8x128xf32>
    %69 = arith.mulf %68, %67 : vector<8x128xf32>
    %cst_32 = arith.constant 5.000000e-01 : f32
    %70 = vector.broadcast %cst_32 : f32 to vector<8x128xf32>
    %71 = arith.addf %69, %70 : vector<8x128xf32>
    %72 = vector.extract_strided_slice %55 {offsets = [0, 256], sizes = [8, 128], strides = [1, 1]} : vector<8x512xf32> to vector<8x128xf32>
    %73 = math.tanh %72 : vector<8x128xf32>
    %74 = vector.extract_strided_slice %55 {offsets = [0, 384], sizes = [8, 128], strides = [1, 1]} : vector<8x512xf32> to vector<8x128xf32>
    %cst_33 = arith.constant 5.000000e-01 : f32
    %75 = vector.broadcast %cst_33 : f32 to vector<8x128xf32>
    %76 = arith.mulf %75, %74 : vector<8x128xf32>
    %77 = math.tanh %76 : vector<8x128xf32>
    %cst_34 = arith.constant 5.000000e-01 : f32
    %78 = vector.broadcast %cst_34 : f32 to vector<8x128xf32>
    %79 = arith.mulf %78, %77 : vector<8x128xf32>
    %cst_35 = arith.constant 5.000000e-01 : f32
    %80 = vector.broadcast %cst_35 : f32 to vector<8x128xf32>
    %81 = arith.addf %79, %80 : vector<8x128xf32>
    %82 = arith.mulf %71, %45 : vector<8x128xf32>
    %83 = arith.mulf %63, %73 : vector<8x128xf32>
    %84 = arith.addf %82, %83 : vector<8x128xf32>
    %85 = math.tanh %84 : vector<8x128xf32>
    %86 = arith.mulf %81, %85 : vector<8x128xf32>
    %c2_i32 = arith.constant 2 : i32
    %c8_i32_36 = arith.constant 8 : i32
    %87 = arith.muli %c2_i32, %c8_i32_36 : i32
    %88 = tpu.assume_multiple %87, 8 : i32
    %89 = arith.index_cast %88 : i32 to index
    %c0_37 = arith.constant 0 : index
    %90 = vector.load %arg7[%89, %c0_37] : memref<64x512xf32, #tpu.memory_space<vmem>>, vector<8x512xf32>
    %91 = arith.truncf %86 : vector<8x128xf32> to vector<8x128xbf16>
    %c0_38 = arith.constant 0 : index
    %c0_39 = arith.constant 0 : index
    %92 = vector.load %arg2[%c0_38, %c0_39] : memref<128x512xbf16, #tpu.memory_space<vmem>>, vector<128x512xbf16>
    %cst_40 = arith.constant dense<0.000000e+00> : vector<8x512xf32>
    %93 = tpu.matmul %91, %92, %cst_40 {dimension_numbers = #tpu.dot_dimension_numbers<[1], [0], [0], [1], [0, 0, 1, 1], [], []>} : vector<8x128xbf16>, vector<128x512xbf16>, vector<8x512xf32> -> vector<8x512xf32>
    %94 = arith.addf %90, %93 : vector<8x512xf32>
    %95 = vector.extract_strided_slice %94 {offsets = [0, 0], sizes = [8, 128], strides = [1, 1]} : vector<8x512xf32> to vector<8x128xf32>
    %cst_41 = arith.constant 5.000000e-01 : f32
    %96 = vector.broadcast %cst_41 : f32 to vector<8x128xf32>
    %97 = arith.mulf %96, %95 : vector<8x128xf32>
    %98 = math.tanh %97 : vector<8x128xf32>
    %cst_42 = arith.constant 5.000000e-01 : f32
    %99 = vector.broadcast %cst_42 : f32 to vector<8x128xf32>
    %100 = arith.mulf %99, %98 : vector<8x128xf32>
    %cst_43 = arith.constant 5.000000e-01 : f32
    %101 = vector.broadcast %cst_43 : f32 to vector<8x128xf32>
    %102 = arith.addf %100, %101 : vector<8x128xf32>
    %103 = vector.extract_strided_slice %94 {offsets = [0, 128], sizes = [8, 128], strides = [1, 1]} : vector<8x512xf32> to vector<8x128xf32>
    %cst_44 = arith.constant 5.000000e-01 : f32
    %104 = vector.broadcast %cst_44 : f32 to vector<8x128xf32>
    %105 = arith.mulf %104, %103 : vector<8x128xf32>
    %106 = math.tanh %105 : vector<8x128xf32>
    %cst_45 = arith.constant 5.000000e-01 : f32
    %107 = vector.broadcast %cst_45 : f32 to vector<8x128xf32>
    %108 = arith.mulf %107, %106 : vector<8x128xf32>
    %cst_46 = arith.constant 5.000000e-01 : f32
    %109 = vector.broadcast %cst_46 : f32 to vector<8x128xf32>
    %110 = arith.addf %108, %109 : vector<8x128xf32>
    %111 = vector.extract_strided_slice %94 {offsets = [0, 256], sizes = [8, 128], strides = [1, 1]} : vector<8x512xf32> to vector<8x128xf32>
    %112 = math.tanh %111 : vector<8x128xf32>
    %113 = vector.extract_strided_slice %94 {offsets = [0, 384], sizes = [8, 128], strides = [1, 1]} : vector<8x512xf32> to vector<8x128xf32>
    %cst_47 = arith.constant 5.000000e-01 : f32
    %114 = vector.broadcast %cst_47 : f32 to vector<8x128xf32>
    %115 = arith.mulf %114, %113 : vector<8x128xf32>
    %116 = math.tanh %115 : vector<8x128xf32>
    %cst_48 = arith.constant 5.000000e-01 : f32
    %117 = vector.broadcast %cst_48 : f32 to vector<8x128xf32>
    %118 = arith.mulf %117, %116 : vector<8x128xf32>
    %cst_49 = arith.constant 5.000000e-01 : f32
    %119 = vector.broadcast %cst_49 : f32 to vector<8x128xf32>
    %120 = arith.addf %118, %119 : vector<8x128xf32>
    %121 = arith.mulf %110, %84 : vector<8x128xf32>
    %122 = arith.mulf %102, %112 : vector<8x128xf32>
    %123 = arith.addf %121, %122 : vector<8x128xf32>
    %124 = math.tanh %123 : vector<8x128xf32>
    %125 = arith.mulf %120, %124 : vector<8x128xf32>
    %c3_i32 = arith.constant 3 : i32
    %c8_i32_50 = arith.constant 8 : i32
    %126 = arith.muli %c3_i32, %c8_i32_50 : i32
    %127 = tpu.assume_multiple %126, 8 : i32
    %128 = arith.index_cast %127 : i32 to index
    %c0_51 = arith.constant 0 : index
    %129 = vector.load %arg7[%128, %c0_51] : memref<64x512xf32, #tpu.memory_space<vmem>>, vector<8x512xf32>
    %130 = arith.truncf %125 : vector<8x128xf32> to vector<8x128xbf16>
    %c0_52 = arith.constant 0 : index
    %c0_53 = arith.constant 0 : index
    %131 = vector.load %arg2[%c0_52, %c0_53] : memref<128x512xbf16, #tpu.memory_space<vmem>>, vector<128x512xbf16>
    %cst_54 = arith.constant dense<0.000000e+00> : vector<8x512xf32>
    %132 = tpu.matmul %130, %131, %cst_54 {dimension_numbers = #tpu.dot_dimension_numbers<[1], [0], [0], [1], [0, 0, 1, 1], [], []>} : vector<8x128xbf16>, vector<128x512xbf16>, vector<8x512xf32> -> vector<8x512xf32>
    %133 = arith.addf %129, %132 : vector<8x512xf32>
    %134 = vector.extract_strided_slice %133 {offsets = [0, 0], sizes = [8, 128], strides = [1, 1]} : vector<8x512xf32> to vector<8x128xf32>
    %cst_55 = arith.constant 5.000000e-01 : f32
    %135 = vector.broadcast %cst_55 : f32 to vector<8x128xf32>
    %136 = arith.mulf %135, %134 : vector<8x128xf32>
    %137 = math.tanh %136 : vector<8x128xf32>
    %cst_56 = arith.constant 5.000000e-01 : f32
    %138 = vector.broadcast %cst_56 : f32 to vector<8x128xf32>
    %139 = arith.mulf %138, %137 : vector<8x128xf32>
    %cst_57 = arith.constant 5.000000e-01 : f32
    %140 = vector.broadcast %cst_57 : f32 to vector<8x128xf32>
    %141 = arith.addf %139, %140 : vector<8x128xf32>
    %142 = vector.extract_strided_slice %133 {offsets = [0, 128], sizes = [8, 128], strides = [1, 1]} : vector<8x512xf32> to vector<8x128xf32>
    %cst_58 = arith.constant 5.000000e-01 : f32
    %143 = vector.broadcast %cst_58 : f32 to vector<8x128xf32>
    %144 = arith.mulf %143, %142 : vector<8x128xf32>
    %145 = math.tanh %144 : vector<8x128xf32>
    %cst_59 = arith.constant 5.000000e-01 : f32
    %146 = vector.broadcast %cst_59 : f32 to vector<8x128xf32>
    %147 = arith.mulf %146, %145 : vector<8x128xf32>
    %cst_60 = arith.constant 5.000000e-01 : f32
    %148 = vector.broadcast %cst_60 : f32 to vector<8x128xf32>
    %149 = arith.addf %147, %148 : vector<8x128xf32>
    %150 = vector.extract_strided_slice %133 {offsets = [0, 256], sizes = [8, 128], strides = [1, 1]} : vector<8x512xf32> to vector<8x128xf32>
    %151 = math.tanh %150 : vector<8x128xf32>
    %152 = vector.extract_strided_slice %133 {offsets = [0, 384], sizes = [8, 128], strides = [1, 1]} : vector<8x512xf32> to vector<8x128xf32>
    %cst_61 = arith.constant 5.000000e-01 : f32
    %153 = vector.broadcast %cst_61 : f32 to vector<8x128xf32>
    %154 = arith.mulf %153, %152 : vector<8x128xf32>
    %155 = math.tanh %154 : vector<8x128xf32>
    %cst_62 = arith.constant 5.000000e-01 : f32
    %156 = vector.broadcast %cst_62 : f32 to vector<8x128xf32>
    %157 = arith.mulf %156, %155 : vector<8x128xf32>
    %cst_63 = arith.constant 5.000000e-01 : f32
    %158 = vector.broadcast %cst_63 : f32 to vector<8x128xf32>
    %159 = arith.addf %157, %158 : vector<8x128xf32>
    %160 = arith.mulf %149, %123 : vector<8x128xf32>
    %161 = arith.mulf %141, %151 : vector<8x128xf32>
    %162 = arith.addf %160, %161 : vector<8x128xf32>
    %163 = math.tanh %162 : vector<8x128xf32>
    %164 = arith.mulf %159, %163 : vector<8x128xf32>
    %c4_i32 = arith.constant 4 : i32
    %c8_i32_64 = arith.constant 8 : i32
    %165 = arith.muli %c4_i32, %c8_i32_64 : i32
    %166 = tpu.assume_multiple %165, 8 : i32
    %167 = arith.index_cast %166 : i32 to index
    %c0_65 = arith.constant 0 : index
    %168 = vector.load %arg7[%167, %c0_65] : memref<64x512xf32, #tpu.memory_space<vmem>>, vector<8x512xf32>
    %169 = arith.truncf %164 : vector<8x128xf32> to vector<8x128xbf16>
    %c0_66 = arith.constant 0 : index
    %c0_67 = arith.constant 0 : index
    %170 = vector.load %arg2[%c0_66, %c0_67] : memref<128x512xbf16, #tpu.memory_space<vmem>>, vector<128x512xbf16>
    %cst_68 = arith.constant dense<0.000000e+00> : vector<8x512xf32>
    %171 = tpu.matmul %169, %170, %cst_68 {dimension_numbers = #tpu.dot_dimension_numbers<[1], [0], [0], [1], [0, 0, 1, 1], [], []>} : vector<8x128xbf16>, vector<128x512xbf16>, vector<8x512xf32> -> vector<8x512xf32>
    %172 = arith.addf %168, %171 : vector<8x512xf32>
    %173 = vector.extract_strided_slice %172 {offsets = [0, 0], sizes = [8, 128], strides = [1, 1]} : vector<8x512xf32> to vector<8x128xf32>
    %cst_69 = arith.constant 5.000000e-01 : f32
    %174 = vector.broadcast %cst_69 : f32 to vector<8x128xf32>
    %175 = arith.mulf %174, %173 : vector<8x128xf32>
    %176 = math.tanh %175 : vector<8x128xf32>
    %cst_70 = arith.constant 5.000000e-01 : f32
    %177 = vector.broadcast %cst_70 : f32 to vector<8x128xf32>
    %178 = arith.mulf %177, %176 : vector<8x128xf32>
    %cst_71 = arith.constant 5.000000e-01 : f32
    %179 = vector.broadcast %cst_71 : f32 to vector<8x128xf32>
    %180 = arith.addf %178, %179 : vector<8x128xf32>
    %181 = vector.extract_strided_slice %172 {offsets = [0, 128], sizes = [8, 128], strides = [1, 1]} : vector<8x512xf32> to vector<8x128xf32>
    %cst_72 = arith.constant 5.000000e-01 : f32
    %182 = vector.broadcast %cst_72 : f32 to vector<8x128xf32>
    %183 = arith.mulf %182, %181 : vector<8x128xf32>
    %184 = math.tanh %183 : vector<8x128xf32>
    %cst_73 = arith.constant 5.000000e-01 : f32
    %185 = vector.broadcast %cst_73 : f32 to vector<8x128xf32>
    %186 = arith.mulf %185, %184 : vector<8x128xf32>
    %cst_74 = arith.constant 5.000000e-01 : f32
    %187 = vector.broadcast %cst_74 : f32 to vector<8x128xf32>
    %188 = arith.addf %186, %187 : vector<8x128xf32>
    %189 = vector.extract_strided_slice %172 {offsets = [0, 256], sizes = [8, 128], strides = [1, 1]} : vector<8x512xf32> to vector<8x128xf32>
    %190 = math.tanh %189 : vector<8x128xf32>
    %191 = vector.extract_strided_slice %172 {offsets = [0, 384], sizes = [8, 128], strides = [1, 1]} : vector<8x512xf32> to vector<8x128xf32>
    %cst_75 = arith.constant 5.000000e-01 : f32
    %192 = vector.broadcast %cst_75 : f32 to vector<8x128xf32>
    %193 = arith.mulf %192, %191 : vector<8x128xf32>
    %194 = math.tanh %193 : vector<8x128xf32>
    %cst_76 = arith.constant 5.000000e-01 : f32
    %195 = vector.broadcast %cst_76 : f32 to vector<8x128xf32>
    %196 = arith.mulf %195, %194 : vector<8x128xf32>
    %cst_77 = arith.constant 5.000000e-01 : f32
    %197 = vector.broadcast %cst_77 : f32 to vector<8x128xf32>
    %198 = arith.addf %196, %197 : vector<8x128xf32>
    %199 = arith.mulf %188, %162 : vector<8x128xf32>
    %200 = arith.mulf %180, %190 : vector<8x128xf32>
    %201 = arith.addf %199, %200 : vector<8x128xf32>
    %202 = math.tanh %201 : vector<8x128xf32>
    %203 = arith.mulf %198, %202 : vector<8x128xf32>
    %c5_i32 = arith.constant 5 : i32
    %c8_i32_78 = arith.constant 8 : i32
    %204 = arith.muli %c5_i32, %c8_i32_78 : i32
    %205 = tpu.assume_multiple %204, 8 : i32
    %206 = arith.index_cast %205 : i32 to index
    %c0_79 = arith.constant 0 : index
    %207 = vector.load %arg7[%206, %c0_79] : memref<64x512xf32, #tpu.memory_space<vmem>>, vector<8x512xf32>
    %208 = arith.truncf %203 : vector<8x128xf32> to vector<8x128xbf16>
    %c0_80 = arith.constant 0 : index
    %c0_81 = arith.constant 0 : index
    %209 = vector.load %arg2[%c0_80, %c0_81] : memref<128x512xbf16, #tpu.memory_space<vmem>>, vector<128x512xbf16>
    %cst_82 = arith.constant dense<0.000000e+00> : vector<8x512xf32>
    %210 = tpu.matmul %208, %209, %cst_82 {dimension_numbers = #tpu.dot_dimension_numbers<[1], [0], [0], [1], [0, 0, 1, 1], [], []>} : vector<8x128xbf16>, vector<128x512xbf16>, vector<8x512xf32> -> vector<8x512xf32>
    %211 = arith.addf %207, %210 : vector<8x512xf32>
    %212 = vector.extract_strided_slice %211 {offsets = [0, 0], sizes = [8, 128], strides = [1, 1]} : vector<8x512xf32> to vector<8x128xf32>
    %cst_83 = arith.constant 5.000000e-01 : f32
    %213 = vector.broadcast %cst_83 : f32 to vector<8x128xf32>
    %214 = arith.mulf %213, %212 : vector<8x128xf32>
    %215 = math.tanh %214 : vector<8x128xf32>
    %cst_84 = arith.constant 5.000000e-01 : f32
    %216 = vector.broadcast %cst_84 : f32 to vector<8x128xf32>
    %217 = arith.mulf %216, %215 : vector<8x128xf32>
    %cst_85 = arith.constant 5.000000e-01 : f32
    %218 = vector.broadcast %cst_85 : f32 to vector<8x128xf32>
    %219 = arith.addf %217, %218 : vector<8x128xf32>
    %220 = vector.extract_strided_slice %211 {offsets = [0, 128], sizes = [8, 128], strides = [1, 1]} : vector<8x512xf32> to vector<8x128xf32>
    %cst_86 = arith.constant 5.000000e-01 : f32
    %221 = vector.broadcast %cst_86 : f32 to vector<8x128xf32>
    %222 = arith.mulf %221, %220 : vector<8x128xf32>
    %223 = math.tanh %222 : vector<8x128xf32>
    %cst_87 = arith.constant 5.000000e-01 : f32
    %224 = vector.broadcast %cst_87 : f32 to vector<8x128xf32>
    %225 = arith.mulf %224, %223 : vector<8x128xf32>
    %cst_88 = arith.constant 5.000000e-01 : f32
    %226 = vector.broadcast %cst_88 : f32 to vector<8x128xf32>
    %227 = arith.addf %225, %226 : vector<8x128xf32>
    %228 = vector.extract_strided_slice %211 {offsets = [0, 256], sizes = [8, 128], strides = [1, 1]} : vector<8x512xf32> to vector<8x128xf32>
    %229 = math.tanh %228 : vector<8x128xf32>
    %230 = vector.extract_strided_slice %211 {offsets = [0, 384], sizes = [8, 128], strides = [1, 1]} : vector<8x512xf32> to vector<8x128xf32>
    %cst_89 = arith.constant 5.000000e-01 : f32
    %231 = vector.broadcast %cst_89 : f32 to vector<8x128xf32>
    %232 = arith.mulf %231, %230 : vector<8x128xf32>
    %233 = math.tanh %232 : vector<8x128xf32>
    %cst_90 = arith.constant 5.000000e-01 : f32
    %234 = vector.broadcast %cst_90 : f32 to vector<8x128xf32>
    %235 = arith.mulf %234, %233 : vector<8x128xf32>
    %cst_91 = arith.constant 5.000000e-01 : f32
    %236 = vector.broadcast %cst_91 : f32 to vector<8x128xf32>
    %237 = arith.addf %235, %236 : vector<8x128xf32>
    %238 = arith.mulf %227, %201 : vector<8x128xf32>
    %239 = arith.mulf %219, %229 : vector<8x128xf32>
    %240 = arith.addf %238, %239 : vector<8x128xf32>
    %241 = math.tanh %240 : vector<8x128xf32>
    %242 = arith.mulf %237, %241 : vector<8x128xf32>
    %c6_i32 = arith.constant 6 : i32
    %c8_i32_92 = arith.constant 8 : i32
    %243 = arith.muli %c6_i32, %c8_i32_92 : i32
    %244 = tpu.assume_multiple %243, 8 : i32
    %245 = arith.index_cast %244 : i32 to index
    %c0_93 = arith.constant 0 : index
    %246 = vector.load %arg7[%245, %c0_93] : memref<64x512xf32, #tpu.memory_space<vmem>>, vector<8x512xf32>
    %247 = arith.truncf %242 : vector<8x128xf32> to vector<8x128xbf16>
    %c0_94 = arith.constant 0 : index
    %c0_95 = arith.constant 0 : index
    %248 = vector.load %arg2[%c0_94, %c0_95] : memref<128x512xbf16, #tpu.memory_space<vmem>>, vector<128x512xbf16>
    %cst_96 = arith.constant dense<0.000000e+00> : vector<8x512xf32>
    %249 = tpu.matmul %247, %248, %cst_96 {dimension_numbers = #tpu.dot_dimension_numbers<[1], [0], [0], [1], [0, 0, 1, 1], [], []>} : vector<8x128xbf16>, vector<128x512xbf16>, vector<8x512xf32> -> vector<8x512xf32>
    %250 = arith.addf %246, %249 : vector<8x512xf32>
    %251 = vector.extract_strided_slice %250 {offsets = [0, 0], sizes = [8, 128], strides = [1, 1]} : vector<8x512xf32> to vector<8x128xf32>
    %cst_97 = arith.constant 5.000000e-01 : f32
    %252 = vector.broadcast %cst_97 : f32 to vector<8x128xf32>
    %253 = arith.mulf %252, %251 : vector<8x128xf32>
    %254 = math.tanh %253 : vector<8x128xf32>
    %cst_98 = arith.constant 5.000000e-01 : f32
    %255 = vector.broadcast %cst_98 : f32 to vector<8x128xf32>
    %256 = arith.mulf %255, %254 : vector<8x128xf32>
    %cst_99 = arith.constant 5.000000e-01 : f32
    %257 = vector.broadcast %cst_99 : f32 to vector<8x128xf32>
    %258 = arith.addf %256, %257 : vector<8x128xf32>
    %259 = vector.extract_strided_slice %250 {offsets = [0, 128], sizes = [8, 128], strides = [1, 1]} : vector<8x512xf32> to vector<8x128xf32>
    %cst_100 = arith.constant 5.000000e-01 : f32
    %260 = vector.broadcast %cst_100 : f32 to vector<8x128xf32>
    %261 = arith.mulf %260, %259 : vector<8x128xf32>
    %262 = math.tanh %261 : vector<8x128xf32>
    %cst_101 = arith.constant 5.000000e-01 : f32
    %263 = vector.broadcast %cst_101 : f32 to vector<8x128xf32>
    %264 = arith.mulf %263, %262 : vector<8x128xf32>
    %cst_102 = arith.constant 5.000000e-01 : f32
    %265 = vector.broadcast %cst_102 : f32 to vector<8x128xf32>
    %266 = arith.addf %264, %265 : vector<8x128xf32>
    %267 = vector.extract_strided_slice %250 {offsets = [0, 256], sizes = [8, 128], strides = [1, 1]} : vector<8x512xf32> to vector<8x128xf32>
    %268 = math.tanh %267 : vector<8x128xf32>
    %269 = vector.extract_strided_slice %250 {offsets = [0, 384], sizes = [8, 128], strides = [1, 1]} : vector<8x512xf32> to vector<8x128xf32>
    %cst_103 = arith.constant 5.000000e-01 : f32
    %270 = vector.broadcast %cst_103 : f32 to vector<8x128xf32>
    %271 = arith.mulf %270, %269 : vector<8x128xf32>
    %272 = math.tanh %271 : vector<8x128xf32>
    %cst_104 = arith.constant 5.000000e-01 : f32
    %273 = vector.broadcast %cst_104 : f32 to vector<8x128xf32>
    %274 = arith.mulf %273, %272 : vector<8x128xf32>
    %cst_105 = arith.constant 5.000000e-01 : f32
    %275 = vector.broadcast %cst_105 : f32 to vector<8x128xf32>
    %276 = arith.addf %274, %275 : vector<8x128xf32>
    %277 = arith.mulf %266, %240 : vector<8x128xf32>
    %278 = arith.mulf %258, %268 : vector<8x128xf32>
    %279 = arith.addf %277, %278 : vector<8x128xf32>
    %280 = math.tanh %279 : vector<8x128xf32>
    %281 = arith.mulf %276, %280 : vector<8x128xf32>
    %c7_i32 = arith.constant 7 : i32
    %c8_i32_106 = arith.constant 8 : i32
    %282 = arith.muli %c7_i32, %c8_i32_106 : i32
    %283 = tpu.assume_multiple %282, 8 : i32
    %284 = arith.index_cast %283 : i32 to index
    %c0_107 = arith.constant 0 : index
    %285 = vector.load %arg7[%284, %c0_107] : memref<64x512xf32, #tpu.memory_space<vmem>>, vector<8x512xf32>
    %286 = arith.truncf %281 : vector<8x128xf32> to vector<8x128xbf16>
    %c0_108 = arith.constant 0 : index
    %c0_109 = arith.constant 0 : index
    %287 = vector.load %arg2[%c0_108, %c0_109] : memref<128x512xbf16, #tpu.memory_space<vmem>>, vector<128x512xbf16>
    %cst_110 = arith.constant dense<0.000000e+00> : vector<8x512xf32>
    %288 = tpu.matmul %286, %287, %cst_110 {dimension_numbers = #tpu.dot_dimension_numbers<[1], [0], [0], [1], [0, 0, 1, 1], [], []>} : vector<8x128xbf16>, vector<128x512xbf16>, vector<8x512xf32> -> vector<8x512xf32>
    %289 = arith.addf %285, %288 : vector<8x512xf32>
    %290 = vector.extract_strided_slice %289 {offsets = [0, 0], sizes = [8, 128], strides = [1, 1]} : vector<8x512xf32> to vector<8x128xf32>
    %cst_111 = arith.constant 5.000000e-01 : f32
    %291 = vector.broadcast %cst_111 : f32 to vector<8x128xf32>
    %292 = arith.mulf %291, %290 : vector<8x128xf32>
    %293 = math.tanh %292 : vector<8x128xf32>
    %cst_112 = arith.constant 5.000000e-01 : f32
    %294 = vector.broadcast %cst_112 : f32 to vector<8x128xf32>
    %295 = arith.mulf %294, %293 : vector<8x128xf32>
    %cst_113 = arith.constant 5.000000e-01 : f32
    %296 = vector.broadcast %cst_113 : f32 to vector<8x128xf32>
    %297 = arith.addf %295, %296 : vector<8x128xf32>
    %298 = vector.extract_strided_slice %289 {offsets = [0, 128], sizes = [8, 128], strides = [1, 1]} : vector<8x512xf32> to vector<8x128xf32>
    %cst_114 = arith.constant 5.000000e-01 : f32
    %299 = vector.broadcast %cst_114 : f32 to vector<8x128xf32>
    %300 = arith.mulf %299, %298 : vector<8x128xf32>
    %301 = math.tanh %300 : vector<8x128xf32>
    %cst_115 = arith.constant 5.000000e-01 : f32
    %302 = vector.broadcast %cst_115 : f32 to vector<8x128xf32>
    %303 = arith.mulf %302, %301 : vector<8x128xf32>
    %cst_116 = arith.constant 5.000000e-01 : f32
    %304 = vector.broadcast %cst_116 : f32 to vector<8x128xf32>
    %305 = arith.addf %303, %304 : vector<8x128xf32>
    %306 = vector.extract_strided_slice %289 {offsets = [0, 256], sizes = [8, 128], strides = [1, 1]} : vector<8x512xf32> to vector<8x128xf32>
    %307 = math.tanh %306 : vector<8x128xf32>
    %308 = vector.extract_strided_slice %289 {offsets = [0, 384], sizes = [8, 128], strides = [1, 1]} : vector<8x512xf32> to vector<8x128xf32>
    %cst_117 = arith.constant 5.000000e-01 : f32
    %309 = vector.broadcast %cst_117 : f32 to vector<8x128xf32>
    %310 = arith.mulf %309, %308 : vector<8x128xf32>
    %311 = math.tanh %310 : vector<8x128xf32>
    %cst_118 = arith.constant 5.000000e-01 : f32
    %312 = vector.broadcast %cst_118 : f32 to vector<8x128xf32>
    %313 = arith.mulf %312, %311 : vector<8x128xf32>
    %cst_119 = arith.constant 5.000000e-01 : f32
    %314 = vector.broadcast %cst_119 : f32 to vector<8x128xf32>
    %315 = arith.addf %313, %314 : vector<8x128xf32>
    %316 = arith.mulf %305, %279 : vector<8x128xf32>
    %317 = arith.mulf %297, %307 : vector<8x128xf32>
    %318 = arith.addf %316, %317 : vector<8x128xf32>
    %319 = math.tanh %318 : vector<8x128xf32>
    %320 = arith.mulf %315, %319 : vector<8x128xf32>
    %c8_i32_120 = arith.constant 8 : i32
    %321 = arith.truncf %320 : vector<8x128xf32> to vector<8x128xbf16>
    %c0_121 = arith.constant 0 : index
    %c0_122 = arith.constant 0 : index
    %322 = vector.load %arg4[%c0_121, %c0_122] : memref<128x128xbf16, #tpu.memory_space<vmem>>, vector<128x128xbf16>
    %cst_123 = arith.constant dense<0.000000e+00> : vector<8x128xf32>
    %323 = tpu.matmul %321, %322, %cst_123 {dimension_numbers = #tpu.dot_dimension_numbers<[1], [0], [0], [1], [0, 0, 1, 1], [], []>} : vector<8x128xbf16>, vector<128x128xbf16>, vector<8x128xf32> -> vector<8x128xf32>
    %c0_124 = arith.constant 0 : index
    %c0_125 = arith.constant 0 : index
    %324 = vector.load %arg5[%c0_124, %c0_125] : memref<1x128xf32, #tpu.memory_space<vmem>>, vector<1x128xf32>
    %325 = vector.broadcast %324 : vector<1x128xf32> to vector<8x128xf32>
    %326 = arith.addf %323, %325 : vector<8x128xf32>
    %c0_126 = arith.constant 0 : index
    %c0_127 = arith.constant 0 : index
    %327 = vector.load %arg6[%c0_126, %c0_127] : memref<8x128xf32, #tpu.memory_space<vmem>>, vector<8x128xf32>
    tpu.vector_store %arg6[%c0_126, %c0_127], %326 {strides = array<i32>} : memref<8x128xf32, #tpu.memory_space<vmem>>, vector<8x128xf32>,
    return
  }
}

</mosaic_0001>

<bundles_post_ra>
// kernel: tpu_custom_call.1
= control target key start
LH: loop header
LB: loop body
LE: loop exit
PB: predicated region body
PF: predicated region fallthrough
CT: control target
= control target key end

     0   :  { %11 = vsyncpa [#allocation4], 0  ;;  %s2563_s0 = inlined_call_operand.vmem [shape: bf16[64,32], index: 0, kind: input, shape index: {}]   ;;  %s2564_s1 = inlined_call_operand.hbm [shape: bf16[32,512], index: 1, kind: input, shape index: {}]   ;;  %s2565_s2 = inlined_call_operand.hbm [shape: bf16[128,512], index: 2, kind: input, shape index: {}]   ;;  %s2566_s3 = inlined_call_operand.vmem [shape: f32[1,512], index: 3, kind: input, shape index: {}]   ;;  %s2567_s4 = inlined_call_operand.hbm [shape: bf16[128,128], index: 4, kind: input, shape index: {}]   ;;  %s2568_s5 = inlined_call_operand.vmem [shape: f32[1,128], index: 5, kind: input, shape index: {}]   ;;  %s2569_s6 = inlined_call_operand.hbm [shape: f32[8,128], index: 6, kind: output, shape index: {}]  }
   0x1   :  { %12 = vsyncpa [#allocation7], 0 }
   0x2   :  { %13 = vsyncpa [#allocation5], 0  ;;  %s1949_s21 = smov [#allocation6]   ;;  %s1950_s23 = smov [#allocation3]  }
   0x3   :  { %s33_s22 = sshll.u32 %s1949_s21, 4  ;;  %s21_s24 = sshll.u32 %s1950_s23, 4  ;;  %s34_s22 = int_to_ptr.vmem [resolvable:$true] %s33_s22  ;;  %s22_s24 = int_to_ptr.vmem [resolvable:$true] %s21_s24 }
   0x4   :  { %s1871_s25 = scalar_lea.vmem %s34_s22, 4096  ;;  %p1876_p1 = scmp.lt.s32.totalorder %s34_s22, %s34_s22 }
   0x5   :  { %p1872_p0 = scmp.ne.s32.totalorder %s34_s22, %s1871_s25  ;;  %p1877_p2 = scmp.lt.s32.totalorder %s1871_s25, %s1871_s25 }
   0x7   :  { %p1878_p3 = por %p1877_p2, %p1876_p1 }
   0x9   :  { %p1879_p4 = pnand %p1878_p3, %p1872_p0 }
   0xb   :  { %1882 = shalt.err (!%p1879_p4)
}
   0xc   :  { %s1951_s26 = smov 256   ;;  %s1952_s27 = smov 16  }
   0xd   :  { %39 = dma.hbm_to_vmem [thread:$0]  %s2565_s2, 4096, %s34_s22, [#allocation7], %s1951_s26, %s1951_s26, %s1952_s27  }
   0xe   :  { %s1891_s30 = scalar_lea.vmem %s22_s24, 1024  ;;  %p1896_p6 = scmp.lt.s32.totalorder %s22_s24, %s22_s24 }
   0xf   :  { %p1892_p5 = scmp.ne.s32.totalorder %s22_s24, %s1891_s30  ;;  %p1897_p7 = scmp.lt.s32.totalorder %s1891_s30, %s1891_s30 }
  0x11   :  { %p1898_p8 = por %p1897_p7, %p1896_p6 }
  0x13   :  { %p1899_p9 = pnand %p1898_p8, %p1892_p5 }
  0x15   :  { %1902 = shalt.err (!%p1899_p9)
}
  0x16   :  { %27 = dma.hbm_to_vmem [thread:$0]  %s2564_s1, 1024, %s22_s24, [#allocation4], %s1951_s26, %s1951_s26, %s1952_s27  }
  0x17   :  { %s1953_s9 = smov [#allocation8]  }
  0x18   :  { %s47_s10 = sshll.u32 %s1953_s9, 4  ;;  %s48_s10 = int_to_ptr.vmem [resolvable:$true] %s47_s10 }
  0x19   :  { %s1911_s11 = scalar_lea.vmem %s48_s10, 1024  ;;  %p1916_p11 = scmp.lt.s32.totalorder %s48_s10, %s48_s10 }
  0x1a   :  { %p1912_p10 = scmp.ne.s32.totalorder %s48_s10, %s1911_s11  ;;  %p1917_p12 = scmp.lt.s32.totalorder %s1911_s11, %s1911_s11 }
  0x1c   :  { %p1918_p13 = por %p1917_p12, %p1916_p11 }
  0x1e   :  { %p1919_p0 = pnand %p1918_p13, %p1912_p10 }
  0x20   :  { %1922 = shalt.err (!%p1919_p0)
}
  0x21   :  { %s1954_s2 = smov 64   ;;  %s1955_s12 = smov 4  }
  0x22   :  { %53 = dma.hbm_to_vmem [thread:$0]  %s2567_s4, 1024, %s48_s10, [#allocation7], %s1954_s2, %s1954_s2, %s1955_s12  }
  0x23   :  { %1943 = dma.done.wait [#allocation4], 1024  }
  0x24   :  { %1944 = vsyncadd [#allocation4], 4294966272 }
  0x25   :  { %1945 = dma.done.wait [#allocation7], 5120  }
  0x26   :  { %1946 = vsyncadd [#allocation7], 4294962176  ;;  %v2570_v0 = vmov 0   ;;  %v1679_v1 = vld [vmem:[#allocation3 + $0x24] ss:$16 sps:$4 sm:$0xff]   ;;  %vm164_vm0 = vcmask 261120   ;;  %v84_v45 = vlaneseq }
  0x27   :  { %209 = vmatprep.mubr.bf16.mxu0 %v2570_v0  ;;  %282 = vmatprep.mubr.bf16.mxu1 %v2570_v0  ;;  %v1681_v2 = vld [vmem:[#allocation3 + $0x2c] ss:$16 sps:$4 sm:$0xff]   ;;  %v1683_v3 = vld [vmem:[#allocation3 + $0x20] ss:$16 sps:$4 sm:$0xff]   ;;  %v1684_v4 = vld [vmem:[#allocation3 + $0x28] ss:$16 sps:$4 sm:$0xff]  }
  0x28   :  { %189 = vmatprep.subr.bf16.mxu0 %v1679_v1  ;;  %262 = vmatprep.subr.bf16.mxu1 %v1681_v2  ;;  %v1685_v5 = vld [vmem:[#allocation3 + $0x4] ss:$16 sps:$4 sm:$0xff]   ;;  %v1687_v6 = vld [vmem:[#allocation3 + $0xc] ss:$16 sps:$4 sm:$0xff]   ;;  %v1689_v7 = vld [vmem:[#allocation3] ss:$16 sps:$4 sm:$0xff]  }
  0x29   :  { %190 = vmatpush1.bf16.msra.mxu0 %v1683_v3  ;;  %263 = vmatpush1.bf16.msra.mxu1 %v1684_v4  ;;  %v1690_v8 = vld [vmem:[#allocation3 + $0x8] ss:$16 sps:$4 sm:$0xff]   ;;  %v1691_v9 = vld [vmem:[%s2563_s0] sm:$0xff]   ;;  %v2011_v11 = vld [vmem:[#allocation6 + $0xec] ss:$16 sps:$4 sm:$0xff]   ;;  %v85_v46 = vshrl.u32 %v84_v45, 7 }
  0x2a   :  { %191 = vmatprep.subr.bf16.mxu0 %v1685_v5  ;;  %264 = vmatprep.subr.bf16.mxu1 %v1687_v6  ;;  %v2009_v10 = vld [vmem:[#allocation6 + $0xe4] ss:$16 sps:$4 sm:$0xff]   ;;  %v2013_v12 = vld [vmem:[#allocation6 + $0xe0] ss:$16 sps:$4 sm:$0xff]   ;;  %v2015_v13 = vld [vmem:[#allocation6 + $0xe8] ss:$16 sps:$4 sm:$0xff]  }
  0x2b   :  { %v2018_v14 = vld [vmem:[#allocation6 + $0xc4] ss:$16 sps:$4 sm:$0xff]   ;;  %v2021_v15 = vld [vmem:[#allocation6 + $0xcc] ss:$16 sps:$4 sm:$0xff]   ;;  %v2025_v16 = vld [vmem:[#allocation6 + $0xc0] ss:$16 sps:$4 sm:$0xff]  }
  0x2c   :  { %v2029_v17 = vld [vmem:[#allocation6 + $0xc8] ss:$16 sps:$4 sm:$0xff]   ;;  %v2033_v18 = vld [vmem:[#allocation6 + $0xa4] ss:$16 sps:$4 sm:$0xff]   ;;  %v2040_v20 = vld [vmem:[#allocation6 + $0xac] ss:$16 sps:$4 sm:$0xff]  }
  0x2d   :  { %192 = vmatpush1.bf16.msra.mxu0 %v1689_v7  ;;  %265 = vmatpush1.bf16.msra.mxu1 %v1690_v8  ;;  %v1704_v19 = vld [vmem:[%s2563_s0 + $0x8] sm:$0xff]   ;;  %v2042_v21 = vld [vmem:[#allocation6 + $0xa0] ss:$16 sps:$4 sm:$0xff]   ;;  %v2050_v23 = vld [vmem:[#allocation6 + $0x84] ss:$16 sps:$4 sm:$0xff]   ;;  %v94_v47 = vsub.s32 2, %v85_v46 }
  0x2e   :  { %554 = vmatprep.subr.bf16.mxu0 %v2009_v10  ;;  %595 = vmatprep.subr.bf16.mxu1 %v2011_v11  ;;  %v2046_v22 = vld [vmem:[#allocation6 + $0xa8] ss:$16 sps:$4 sm:$0xff]   ;;  %v2052_v24 = vld [vmem:[#allocation6 + $0x8c] ss:$16 sps:$4 sm:$0xff]   ;;  %v2056_v25 = vld [vmem:[#allocation6 + $0x80] ss:$16 sps:$4 sm:$0xff]  }
  0x2f   :  { %v2060_v26 = vld [vmem:[#allocation6 + $0x88] ss:$16 sps:$4 sm:$0xff]   ;;  %v2064_v27 = vld [vmem:[#allocation6 + $0x64] ss:$16 sps:$4 sm:$0xff]   ;;  %v2066_v28 = vld [vmem:[#allocation6 + $0x6c] ss:$16 sps:$4 sm:$0xff]  }
  0x30   :  { %1590 = vmatmul.mubr.msk.bf16.vlgmr.msra.gmra.mxu0 %vm164_vm0, %v1691_v9  ;;  %1594 = vmatmul.mubr.msk.bf16.vlgmr.msra.gmra.mxu1 %vm164_vm0, %v1691_v9  ;;  %v1717_v29 = vld [vmem:[%s2563_s0 + $0x10] sm:$0xff]   ;;  %v2075_v31 = vld [vmem:[#allocation6 + $0x68] ss:$16 sps:$4 sm:$0xff]   ;;  %v2083_v33 = vld [vmem:[#allocation6 + $0x4c] ss:$16 sps:$4 sm:$0xff]   ;;  %v86_v48 = vsub.s32 0, %v85_v46 }
  0x31   :  { %555 = vmatpush1.bf16.msra.mxu0 %v2013_v12  ;;  %596 = vmatpush1.bf16.msra.mxu1 %v2015_v13  ;;  %v2073_v30 = vld [vmem:[#allocation6 + $0x60] ss:$16 sps:$4 sm:$0xff]   ;;  %v2079_v32 = vld [vmem:[#allocation6 + $0x44] ss:$16 sps:$4 sm:$0xff]   ;;  %v2089_v35 = vld [vmem:[#allocation6 + $0x48] ss:$16 sps:$4 sm:$0xff]  }
  0x32   :  { %556 = vmatprep.subr.bf16.mxu0 %v2018_v14  ;;  %597 = vmatprep.subr.bf16.mxu1 %v2021_v15  ;;  %v2087_v34 = vld [vmem:[#allocation6 + $0x40] ss:$16 sps:$4 sm:$0xff]   ;;  %v2093_v36 = vld [vmem:[#allocation6 + $0x24] ss:$16 sps:$4 sm:$0xff]   ;;  %v2097_v37 = vld [vmem:[#allocation6 + $0x2c] ss:$16 sps:$4 sm:$0xff]  }
  0x33   :  { %219 = vmatprep.mubr.bf16.mxu0 %v2570_v0  ;;  %292 = vmatprep.mubr.bf16.mxu1 %v2570_v0  ;;  %v1730_v38 = vld [vmem:[%s2563_s0 + $0x18] sm:$0xff]   ;;  %v2104_v39 = vld [vmem:[#allocation6 + $0x20] ss:$16 sps:$4 sm:$0xff]   ;;  %v2108_v41 = vld [vmem:[#allocation6 + $0x4] ss:$16 sps:$4 sm:$0xff]   ;;  %v98_v49 = vsub.s32 3, %v85_v46 }
  0x34   :  { %v2106_v40 = vld [vmem:[#allocation6 + $0x28] ss:$16 sps:$4 sm:$0xff]   ;;  %v2110_v42 = vld [vmem:[#allocation6 + $0xc] ss:$16 sps:$4 sm:$0xff]   ;;  %v2120_v43 = vld [vmem:[#allocation6] ss:$16 sps:$4 sm:$0xff]  }
  0x35   :  { %557 = vmatpush1.bf16.msra.mxu0 %v2025_v16  ;;  %598 = vmatpush1.bf16.msra.mxu1 %v2029_v17  ;;  %v2122_v44 = vld [vmem:[#allocation6 + $0x8] ss:$16 sps:$4 sm:$0xff]   ;;  %v82_v50 = vld [vmem:[%s2566_s3] sm:$0xf]  ;;  %v90_v54 = vsub.s32 1, %v85_v46  ;;  %vm1958_vm1 = vmmov 0  }
  0x36   :  { %558 = vmatprep.subr.bf16.mxu0 %v2033_v18  ;;  %599 = vmatprep.subr.bf16.mxu1 %v2040_v20  ;;  %v2175_v53 = vrot.slane %v82_v50, %v94_v47  ;;  %v87_v57 = vrot.slane %v82_v50, %v86_v48  ;;  %v2181_v58 = vrot.slane %v82_v50, %v98_v49  ;;  %s1959_s23 = smov [#allocation9]  }
  0x37   :  { %v91_v61 = vrot.slane %v82_v50, %v90_v54  ;;  %s1561_s24 = sshll.u32 %s1959_s23, 4  ;;  %s1562_s24 = int_to_ptr.vmem [resolvable:$true] %s1561_s24 }
  0x38   :  { %1591 = vmatmul.mubr.msk.bf16.gmra.mxu0 %vm164_vm0, %v1704_v19  ;;  %1595 = vmatmul.mubr.msk.bf16.gmra.mxu1 %vm164_vm0, %v1704_v19  ;;  %s1923_s25 = scalar_lea.vmem %s1562_s24, 128  ;;  %p1928_p2 = scmp.lt.s32.totalorder %s1562_s24, %s1562_s24 }
  0x39   :  { %559 = vmatpush1.bf16.msra.mxu0 %v2042_v21  ;;  %600 = vmatpush1.bf16.msra.mxu1 %v2046_v22  ;;  %p1924_p1 = scmp.ne.s32.totalorder %s1562_s24, %s1923_s25  ;;  %p1929_p3 = scmp.lt.s32.totalorder %s1923_s25, %s1923_s25 }
  0x3a   :  { %560 = vmatprep.subr.bf16.mxu0 %v2050_v23  ;;  %601 = vmatprep.subr.bf16.mxu1 %v2052_v24 }
  0x3b   :  { %229 = vmatprep.mubr.bf16.mxu0 %v2570_v0  ;;  %302 = vmatprep.mubr.bf16.mxu1 %v2570_v0  ;;  %p1930_p4 = por %p1929_p3, %p1928_p2 }
  0x3d   :  { %561 = vmatpush1.bf16.msra.mxu0 %v2056_v25  ;;  %602 = vmatpush1.bf16.msra.mxu1 %v2060_v26  ;;  %p1931_p5 = pnand %p1930_p4, %p1924_p1 }
  0x3e   :  { %562 = vmatprep.subr.bf16.mxu0 %v2064_v27  ;;  %603 = vmatprep.subr.bf16.mxu1 %v2066_v28 }
  0x40   :  { %1592 = vmatmul.mubr.msk.bf16.gmra.mxu0 %vm164_vm0, %v1717_v29  ;;  %1596 = vmatmul.mubr.msk.bf16.gmra.mxu1 %vm164_vm0, %v1717_v29 }
  0x41   :  { %563 = vmatpush1.bf16.msra.mxu0 %v2073_v30  ;;  %604 = vmatpush1.bf16.msra.mxu1 %v2075_v31 }
  0x42   :  { %564 = vmatprep.subr.bf16.mxu0 %v2079_v32  ;;  %605 = vmatprep.subr.bf16.mxu1 %v2083_v33 }
  0x43   :  { %239 = vmatprep.mubr.bf16.mxu0 %v2570_v0  ;;  %312 = vmatprep.mubr.bf16.mxu1 %v2570_v0 }
  0x45   :  { %565 = vmatpush1.bf16.msra.mxu0 %v2087_v34  ;;  %606 = vmatpush1.bf16.msra.mxu1 %v2089_v35 }
  0x46   :  { %566 = vmatprep.subr.bf16.mxu0 %v2093_v36  ;;  %607 = vmatprep.subr.bf16.mxu1 %v2097_v37 }
  0x48   :  { %1593 = vmatmul.mubr.msk.bf16.gmra.mxu0 %vm164_vm0, %v1730_v38  ;;  %1597 = vmatmul.mubr.msk.bf16.gmra.mxu1 %vm164_vm0, %v1730_v38 }
  0x49   :  { %567 = vmatpush1.bf16.msra.mxu0 %v2104_v39  ;;  %608 = vmatpush1.bf16.msra.mxu1 %v2106_v40 }
  0x4a   :  { %568 = vmatprep.subr.bf16.mxu0 %v2108_v41  ;;  %609 = vmatprep.subr.bf16.mxu1 %v2110_v42 }
  0x4b   :  { %586 = vmatprep.mubr.bf16.mxu0 %v2570_v0  ;;  %627 = vmatprep.mubr.bf16.mxu1 %v2570_v0 }
  0x4d   :  { %569 = vmatpush1.bf16.msra.mxu0 %v2120_v43  ;;  %610 = vmatpush1.bf16.msra.mxu1 %v2122_v44 }
  0x4e   :  { %666 = vmatprep.subr.bf16.mxu0 %v2009_v10  ;;  %707 = vmatprep.subr.bf16.mxu1 %v2011_v11 }
  0x50   :  { %587 = vmatmul.mubr.bf16.vlgmr.msra.gmra.mxu0 %v2570_v0  ;;  %628 = vmatmul.mubr.bf16.vlgmr.msra.gmra.mxu1 %v2570_v0 }
  0x51   :  { %667 = vmatpush1.bf16.msra.mxu0 %v2013_v12  ;;  %708 = vmatpush1.bf16.msra.mxu1 %v2015_v13 }
  0x52   :  { %668 = vmatprep.subr.bf16.mxu0 %v2018_v14  ;;  %709 = vmatprep.subr.bf16.mxu1 %v2021_v15 }
  0x53   :  { %698 = vmatprep.mubr.bf16.mxu0 %v2570_v0  ;;  %739 = vmatprep.mubr.bf16.mxu1 %v2570_v0 }
  0x55   :  { %669 = vmatpush1.bf16.msra.mxu0 %v2025_v16  ;;  %710 = vmatpush1.bf16.msra.mxu1 %v2029_v17 }
  0x56   :  { %670 = vmatprep.subr.bf16.mxu0 %v2033_v18  ;;  %711 = vmatprep.subr.bf16.mxu1 %v2040_v20 }
  0x59   :  { %671 = vmatpush1.bf16.msra.mxu0 %v2042_v21  ;;  %712 = vmatpush1.bf16.msra.mxu1 %v2046_v22 }
  0x5a   :  { %672 = vmatprep.subr.bf16.mxu0 %v2050_v23  ;;  %713 = vmatprep.subr.bf16.mxu1 %v2052_v24 }
  0x5d   :  { %673 = vmatpush1.bf16.msra.mxu0 %v2056_v25  ;;  %714 = vmatpush1.bf16.msra.mxu1 %v2060_v26 }
  0x5e   :  { %674 = vmatprep.subr.bf16.mxu0 %v2064_v27  ;;  %715 = vmatprep.subr.bf16.mxu1 %v2066_v28 }
  0x61   :  { %675 = vmatpush1.bf16.msra.mxu0 %v2073_v30  ;;  %716 = vmatpush1.bf16.msra.mxu1 %v2075_v31 }
  0x62   :  { %676 = vmatprep.subr.bf16.mxu0 %v2079_v32  ;;  %717 = vmatprep.subr.bf16.mxu1 %v2083_v33 }
  0x65   :  { %677 = vmatpush1.bf16.msra.mxu0 %v2087_v34  ;;  %718 = vmatpush1.bf16.msra.mxu1 %v2089_v35 }
  0x66   :  { %678 = vmatprep.subr.bf16.mxu0 %v2093_v36  ;;  %719 = vmatprep.subr.bf16.mxu1 %v2097_v37 }
  0x69   :  { %679 = vmatpush1.bf16.msra.mxu0 %v2104_v39  ;;  %720 = vmatpush1.bf16.msra.mxu1 %v2106_v40 }
  0x6a   :  { %680 = vmatprep.subr.bf16.mxu0 %v2108_v41  ;;  %721 = vmatprep.subr.bf16.mxu1 %v2110_v42 }
  0x6d   :  { %681 = vmatpush1.bf16.msra.mxu0 %v2120_v43  ;;  %722 = vmatpush1.bf16.msra.mxu1 %v2122_v44 }
  0x6e   :  { %778 = vmatprep.subr.bf16.mxu0 %v2009_v10  ;;  %819 = vmatprep.subr.bf16.mxu1 %v2011_v11 }
  0xf0   :  { %v2171_v51 = vpop.f32.mrf.mxu0  ;;  %v2173_v52 = vpop.f32.mrf.mxu1 }
  0xf2   :  { %v2177_v55 = vpop.f32.mrf.mxu0  ;;  %v2179_v56 = vpop.f32.mrf.mxu1 }
  0xf4   :  { %v215_v59 = vpop.f32.mrf.mxu0  ;;  %v288_v60 = vpop.f32.mrf.mxu1 }
  0xf5   :  { %v2183_v62 = vadd.f32 %v215_v59, %v87_v57  ;;  %v2186_v63 = vadd.f32 %v288_v60, %v2175_v53 }
  0xf6   :  { %v217_v1 = vpop.f32.mrf.mxu0  ;;  %v290_v2 = vpop.f32.mrf.mxu1 }
  0xf7   :  { %v2188_v3 = vadd.f32 %v217_v1, %v91_v61  ;;  %v2191_v4 = vadd.f32 %v290_v2, %v2181_v58 }
  0xf8   :  { %v221_v5 = vpop.f32.mrf.mxu0  ;;  %v294_v6 = vpop.f32.mrf.mxu1 }
  0xf9   :  { %v2193_v7 = vadd.f32 %v221_v5, %v87_v57  ;;  %v2196_v8 = vadd.f32 %v294_v6, %v2175_v53 }
  0xfa   :  { %v223_v9 = vpop.f32.mrf.mxu0  ;;  %v296_v19 = vpop.f32.mrf.mxu1 }
  0xfb   :  { %v2198_v29 = vadd.f32 %v223_v9, %v91_v61  ;;  %v2201_v38 = vadd.f32 %v296_v19, %v2181_v58 }
  0xfc   :  { %v225_v45 = vpop.f32.mrf.mxu0  ;;  %v298_v46 = vpop.f32.mrf.mxu1 }
  0xfd   :  { %v2203_v47 = vadd.f32 %v225_v45, %v87_v57  ;;  %v2206_v48 = vadd.f32 %v298_v46, %v2175_v53 }
  0xfe   :  { %v227_v49 = vpop.f32.mrf.mxu0  ;;  %v300_v50 = vpop.f32.mrf.mxu1 }
  0xff   :  { %2572 = vst [vmem:[#allocation13_spill] sm:$0xff] %v2203_v47  ;;  %2573 = vst [vmem:[#allocation14_spill] sm:$0xff] %v2206_v48  ;;  %v2208_v54 = vadd.f32 %v227_v49, %v91_v61  ;;  %v2211_v59 = vadd.f32 %v300_v50, %v2181_v58  ;;  %v285_v47 = vadd.f32 %v2173_v52, %v2175_v53 }
 0x100   :  { %v231_v60 = vpop.f32.mrf.mxu0  ;;  %v304_v1 = vpop.f32.mrf.mxu1 }
 0x101   :  { %2574 = vst [vmem:[#allocation15_spill] sm:$0xff] %v2208_v54  ;;  %2575 = vst [vmem:[#allocation16_spill] sm:$0xff] %v2211_v59  ;;  %v2213_v2 = vadd.f32 %v231_v60, %v87_v57  ;;  %v2216_v5 = vadd.f32 %v304_v1, %v2175_v53 }
 0x102   :  { %v233_v6 = vpop.f32.mrf.mxu0  ;;  %v306_v9 = vpop.f32.mrf.mxu1 }
 0x103   :  { %2576 = vst [vmem:[#allocation17_spill] sm:$0xff] %v2213_v2  ;;  %2577 = vst [vmem:[#allocation18_spill] sm:$0xff] %v2216_v5  ;;  %v2218_v19 = vadd.f32 %v233_v6, %v91_v61  ;;  %v2221_v45 = vadd.f32 %v306_v9, %v2181_v58 }
 0x104   :  { %v235_v46 = vpop.f32.mrf.mxu0  ;;  %v308_v49 = vpop.f32.mrf.mxu1 }
 0x105   :  { %2578 = vst [vmem:[#allocation19_spill] sm:$0xff] %v2218_v19  ;;  %2579 = vst [vmem:[#allocation20_spill] sm:$0xff] %v2221_v45  ;;  %v2223_v0 = vadd.f32 %v235_v46, %v87_v57  ;;  %v2226_v50 = vadd.f32 %v308_v49, %v2175_v53 }
 0x106   :  { %v237_v59 = vpop.f32.mrf.mxu0  ;;  %v310_v60 = vpop.f32.mrf.mxu1 }
 0x107   :  { %2580 = vst [vmem:[#allocation21_spill] sm:$0xff] %v2223_v0  ;;  %2581 = vst [vmem:[#allocation22_spill] sm:$0xff] %v2226_v50  ;;  %v2228_v2 = vadd.f32 %v237_v59, %v91_v61  ;;  %v2231_v1 = vadd.f32 %v310_v60, %v2181_v58 }
 0x108   :  { %v241_v5 = vpop.f32.mrf.mxu0  ;;  %v314_v6 = vpop.f32.mrf.mxu1 }
 0x109   :  { %2582 = vst [vmem:[#allocation23_spill] sm:$0xff] %v2228_v2  ;;  %2583 = vst [vmem:[#allocation24_spill] sm:$0xff] %v2231_v1  ;;  %v2233_v19 = vadd.f32 %v241_v5, %v87_v57  ;;  %v2236_v9 = vadd.f32 %v314_v6, %v2175_v53 }
 0x10a   :  { %v243_v45 = vpop.f32.mrf.mxu0  ;;  %v316_v46 = vpop.f32.mrf.mxu1 }
 0x10b   :  { %2584 = vst [vmem:[#allocation25_spill] sm:$0xff] %v2233_v19  ;;  %2585 = vst [vmem:[#allocation26_spill] sm:$0xff] %v2236_v9  ;;  %v2238_v0 = vadd.f32 %v243_v45, %v91_v61  ;;  %v2241_v49 = vadd.f32 %v316_v46, %v2181_v58  ;;  %v212_v19 = vadd.f32 %v2171_v51, %v87_v57 }
 0x10c   :  { %v245_v50 = vpop.f32.mrf.mxu0  ;;  %v318_v59 = vpop.f32.mrf.mxu1  ;;  %v214_v46 = vadd.f32 %v2177_v55, %v91_v61 }
 0x10d   :  { %2586 = vst [vmem:[#allocation27_spill] sm:$0xff] %v2238_v0  ;;  %2587 = vst [vmem:[#allocation28_spill] sm:$0xff] %v2241_v49  ;;  %v2243_v2 = vadd.f32 %v245_v50, %v87_v57  ;;  %v2246_v60 = vadd.f32 %v318_v59, %v2175_v53 }
 0x10e   :  { %v247_v1 = vpop.f32.mrf.mxu0  ;;  %v320_v5 = vpop.f32.mrf.mxu1 }
 0x10f   :  { %2588 = vst [vmem:[#allocation29_spill] sm:$0xff] %v2243_v2  ;;  %2589 = vst [vmem:[#allocation30_spill] sm:$0xff] %v2246_v60  ;;  %v2249_v6 = vadd.f32 %v247_v1, %v91_v61  ;;  %v2252_v9 = vadd.f32 %v320_v5, %v2181_v58 }
 0x110   :  { %v588_v45 = vpop.f32.mrf.mxu0  ;;  %v629_v0 = vpop.f32.mrf.mxu1 }
 0x111   :  { %2590 = vst [vmem:[#allocation31_spill] sm:$0xff] %v2252_v9  ;;  %v636_v49 = vadd.f32 %v588_v45, %v212_v19  ;;  %v638_v5 = vadd.f32 %v629_v0, %v285_v47  ;;  %v287_v9 = vadd.f32 %v2179_v56, %v2181_v58 }
 0x112   :  { %v590_v48 = vpop.f32.mrf.mxu0  ;;  %v631_v50 = vpop.f32.mrf.mxu1 }
 0x113   :  { %v640_v2 = vmul.f32 0.5, %v636_v49  ;;  %v637_v54 = vadd.f32 %v590_v48, %v214_v46  ;;  %v639_v55 = vadd.f32 %v631_v50, %v287_v9 }
 0x114   :  { %v592_v59 = vpop.f32.mrf.mxu0  ;;  %v633_v60 = vpop.f32.mrf.mxu1 }
 0x115   :  { %1751 = vtanh.f32 %v640_v2  ;;  %v644_v51 = vmul.f32 0.5, %v637_v54  ;;  %v649_v61 = vmul.f32 0.5, %v639_v55  ;;  %v2591_v59 = vmov 0  }
 0x116   :  { %v593_v57 = vpop.f32.mrf.mxu0  ;;  %v634_v1 = vpop.f32.mrf.mxu1 }
 0x117   :  { %1753 = vtanh.f32 %v644_v51 }
 0x118   :  { %1755 = vtanh.f32 %v638_v5 }
 0x119   :  { %1757 = vtanh.f32 %v649_v61 }
 0x122   :  { %v1752_v19 = vpop.eup %1751 }
 0x123   :  { %v642_v49 = vmul.f32 0.5, %v1752_v19 }
 0x124   :  { %v1754_v48 = vpop.eup %1753 }
 0x125   :  { %v643_v45 = vadd.f32 0.5, %v642_v49  ;;  %v646_v60 = vmul.f32 0.5, %v1754_v48  ;;  %v1756_v52 = vpop.eup %1755 }
 0x126   :  { %v1758_v0 = vpop.eup %1757 }
 0x127   :  { %v647_v46 = vadd.f32 0.5, %v646_v60  ;;  %v654_v54 = vmul.f32 %v1756_v52, %v643_v45  ;;  %v651_v47 = vmul.f32 0.5, %v1758_v0 }
 0x129   :  { %v653_v53 = vmul.f32 0.0, %v647_v46  ;;  %v652_v56 = vadd.f32 0.5, %v651_v47 }
 0x12b   :  { %v2259_v2 = vadd.f32 %v654_v54, %v653_v53 }
 0x12d   :  { %1759 = vtanh.f32 %v2259_v2 }
 0x13a   :  { %v1760_v58 = vpop.eup %1759 }
 0x13b   :  { %v657_v9 = vmul.f32 %v1760_v58, %v652_v56 }
 0x13d   :  { %v665_v50 = vpack.c.bf16 %v657_v9, %v657_v9 }
 0x13f   :  { %699 = vmatmul.mubr.bf16.vlgmr.msra.gmra.mxu0 %v665_v50  ;;  %740 = vmatmul.mubr.bf16.vlgmr.msra.gmra.mxu1 %v665_v50 }
 0x140   :  { %779 = vmatpush1.bf16.msra.mxu0 %v2013_v12  ;;  %820 = vmatpush1.bf16.msra.mxu1 %v2015_v13 }
 0x141   :  { %780 = vmatprep.subr.bf16.mxu0 %v2018_v14  ;;  %821 = vmatprep.subr.bf16.mxu1 %v2021_v15 }
 0x142   :  { %810 = vmatprep.mubr.bf16.mxu0 %v2591_v59  ;;  %851 = vmatprep.mubr.bf16.mxu1 %v2591_v59 }
 0x144   :  { %781 = vmatpush1.bf16.msra.mxu0 %v2025_v16  ;;  %822 = vmatpush1.bf16.msra.mxu1 %v2029_v17 }
 0x145   :  { %782 = vmatprep.subr.bf16.mxu0 %v2033_v18  ;;  %823 = vmatprep.subr.bf16.mxu1 %v2040_v20 }
 0x148   :  { %783 = vmatpush1.bf16.msra.mxu0 %v2042_v21  ;;  %824 = vmatpush1.bf16.msra.mxu1 %v2046_v22 }
 0x149   :  { %784 = vmatprep.subr.bf16.mxu0 %v2050_v23  ;;  %825 = vmatprep.subr.bf16.mxu1 %v2052_v24 }
 0x14c   :  { %785 = vmatpush1.bf16.msra.mxu0 %v2056_v25  ;;  %826 = vmatpush1.bf16.msra.mxu1 %v2060_v26 }
 0x14d   :  { %786 = vmatprep.subr.bf16.mxu0 %v2064_v27  ;;  %827 = vmatprep.subr.bf16.mxu1 %v2066_v28 }
 0x150   :  { %787 = vmatpush1.bf16.msra.mxu0 %v2073_v30  ;;  %828 = vmatpush1.bf16.msra.mxu1 %v2075_v31 }
 0x151   :  { %788 = vmatprep.subr.bf16.mxu0 %v2079_v32  ;;  %829 = vmatprep.subr.bf16.mxu1 %v2083_v33 }
 0x154   :  { %789 = vmatpush1.bf16.msra.mxu0 %v2087_v34  ;;  %830 = vmatpush1.bf16.msra.mxu1 %v2089_v35 }
 0x155   :  { %790 = vmatprep.subr.bf16.mxu0 %v2093_v36  ;;  %831 = vmatprep.subr.bf16.mxu1 %v2097_v37 }
 0x158   :  { %791 = vmatpush1.bf16.msra.mxu0 %v2104_v39  ;;  %832 = vmatpush1.bf16.msra.mxu1 %v2106_v40 }
 0x159   :  { %792 = vmatprep.subr.bf16.mxu0 %v2108_v41  ;;  %833 = vmatprep.subr.bf16.mxu1 %v2110_v42 }
 0x15c   :  { %793 = vmatpush1.bf16.msra.mxu0 %v2120_v43  ;;  %834 = vmatpush1.bf16.msra.mxu1 %v2122_v44 }
 0x15d   :  { %890 = vmatprep.subr.bf16.mxu0 %v2009_v10  ;;  %931 = vmatprep.subr.bf16.mxu1 %v2011_v11 }
 0x1ff   :  { %v700_v51 = vpop.f32.mrf.mxu0  ;;  %v741_v57 = vpop.f32.mrf.mxu1 }
 0x200   :  { %v748_v1 = vadd.f32 %v700_v51, %v2183_v62  ;;  %v750_v45 = vadd.f32 %v741_v57, %v2186_v63 }
 0x201   :  { %v702_v5 = vpop.f32.mrf.mxu0  ;;  %v743_v55 = vpop.f32.mrf.mxu1 }
 0x202   :  { %v752_v61 = vmul.f32 0.5, %v748_v1  ;;  %v749_v19 = vadd.f32 %v702_v5, %v2188_v3  ;;  %v751_v53 = vadd.f32 %v743_v55, %v2191_v4 }
 0x203   :  { %v704_v49 = vpop.f32.mrf.mxu0  ;;  %v745_v48 = vpop.f32.mrf.mxu1 }
 0x204   :  { %1761 = vtanh.f32 %v752_v61  ;;  %v756_v60 = vmul.f32 0.5, %v749_v19  ;;  %v761_v54 = vmul.f32 0.5, %v751_v53 }
 0x205   :  { %v705_v46 = vpop.f32.mrf.mxu0  ;;  %v746_v52 = vpop.f32.mrf.mxu1 }
 0x206   :  { %1763 = vtanh.f32 %v756_v60 }
 0x207   :  { %1765 = vtanh.f32 %v750_v45 }
 0x208   :  { %1767 = vtanh.f32 %v761_v54 }
 0x211   :  { %v1762_v0 = vpop.eup %1761 }
 0x212   :  { %v754_v62 = vmul.f32 0.5, %v1762_v0 }
 0x213   :  { %v1764_v47 = vpop.eup %1763 }
 0x214   :  { %v755_v56 = vadd.f32 0.5, %v754_v62  ;;  %v758_v58 = vmul.f32 0.5, %v1764_v47  ;;  %v1766_v3 = vpop.eup %1765 }
 0x215   :  { %v1768_v57 = vpop.eup %1767 }
 0x216   :  { %v759_v9 = vadd.f32 0.5, %v758_v58  ;;  %v766_v50 = vmul.f32 %v1766_v3, %v755_v56  ;;  %v763_v1 = vmul.f32 0.5, %v1768_v57 }
 0x218   :  { %v765_v51 = vmul.f32 %v759_v9, %v2259_v2  ;;  %v764_v5 = vadd.f32 0.5, %v763_v1 }
 0x21a   :  { %v2301_v63 = vadd.f32 %v766_v50, %v765_v51 }
 0x21c   :  { %1769 = vtanh.f32 %v2301_v63 }
 0x229   :  { %v1770_v4 = vpop.eup %1769 }
 0x22a   :  { %v769_v55 = vmul.f32 %v1770_v4, %v764_v5 }
 0x22c   :  { %v777_v61 = vpack.c.bf16 %v769_v55, %v769_v55 }
 0x22e   :  { %811 = vmatmul.mubr.bf16.vlgmr.msra.gmra.mxu0 %v777_v61  ;;  %852 = vmatmul.mubr.bf16.vlgmr.msra.gmra.mxu1 %v777_v61 }
 0x22f   :  { %891 = vmatpush1.bf16.msra.mxu0 %v2013_v12  ;;  %932 = vmatpush1.bf16.msra.mxu1 %v2015_v13 }
 0x230   :  { %892 = vmatprep.subr.bf16.mxu0 %v2018_v14  ;;  %933 = vmatprep.subr.bf16.mxu1 %v2021_v15 }
 0x231   :  { %922 = vmatprep.mubr.bf16.mxu0 %v2591_v59  ;;  %963 = vmatprep.mubr.bf16.mxu1 %v2591_v59 }
 0x233   :  { %893 = vmatpush1.bf16.msra.mxu0 %v2025_v16  ;;  %934 = vmatpush1.bf16.msra.mxu1 %v2029_v17 }
 0x234   :  { %894 = vmatprep.subr.bf16.mxu0 %v2033_v18  ;;  %935 = vmatprep.subr.bf16.mxu1 %v2040_v20 }
 0x237   :  { %895 = vmatpush1.bf16.msra.mxu0 %v2042_v21  ;;  %936 = vmatpush1.bf16.msra.mxu1 %v2046_v22 }
 0x238   :  { %896 = vmatprep.subr.bf16.mxu0 %v2050_v23  ;;  %937 = vmatprep.subr.bf16.mxu1 %v2052_v24 }
 0x23b   :  { %897 = vmatpush1.bf16.msra.mxu0 %v2056_v25  ;;  %938 = vmatpush1.bf16.msra.mxu1 %v2060_v26 }
 0x23c   :  { %898 = vmatprep.subr.bf16.mxu0 %v2064_v27  ;;  %939 = vmatprep.subr.bf16.mxu1 %v2066_v28 }
 0x23f   :  { %899 = vmatpush1.bf16.msra.mxu0 %v2073_v30  ;;  %940 = vmatpush1.bf16.msra.mxu1 %v2075_v31 }
 0x240   :  { %900 = vmatprep.subr.bf16.mxu0 %v2079_v32  ;;  %941 = vmatprep.subr.bf16.mxu1 %v2083_v33 }
 0x243   :  { %901 = vmatpush1.bf16.msra.mxu0 %v2087_v34  ;;  %942 = vmatpush1.bf16.msra.mxu1 %v2089_v35 }
 0x244   :  { %902 = vmatprep.subr.bf16.mxu0 %v2093_v36  ;;  %943 = vmatprep.subr.bf16.mxu1 %v2097_v37 }
 0x247   :  { %903 = vmatpush1.bf16.msra.mxu0 %v2104_v39  ;;  %944 = vmatpush1.bf16.msra.mxu1 %v2106_v40 }
 0x248   :  { %904 = vmatprep.subr.bf16.mxu0 %v2108_v41  ;;  %945 = vmatprep.subr.bf16.mxu1 %v2110_v42 }
 0x24b   :  { %905 = vmatpush1.bf16.msra.mxu0 %v2120_v43  ;;  %946 = vmatpush1.bf16.msra.mxu1 %v2122_v44 }
 0x24c   :  { %1002 = vmatprep.subr.bf16.mxu0 %v2009_v10  ;;  %1043 = vmatprep.subr.bf16.mxu1 %v2011_v11 }
 0x2ee   :  { %v812_v2 = vpop.f32.mrf.mxu0  ;;  %v853_v19 = vpop.f32.mrf.mxu1 }
 0x2ef   :  { %v860_v49 = vadd.f32 %v812_v2, %v2193_v7  ;;  %v862_v54 = vadd.f32 %v853_v19, %v2196_v8 }
 0x2f0   :  { %v814_v48 = vpop.f32.mrf.mxu0  ;;  %v855_v45 = vpop.f32.mrf.mxu1 }
 0x2f1   :  { %v864_v60 = vmul.f32 0.5, %v860_v49  ;;  %v861_v46 = vadd.f32 %v814_v48, %v2198_v29  ;;  %v863_v56 = vadd.f32 %v855_v45, %v2201_v38  ;;  %v2592_v48 = vld [vmem:[#allocation13_spill] sm:$0xff] }
 0x2f2   :  { %v816_v52 = vpop.f32.mrf.mxu0  ;;  %v857_v53 = vpop.f32.mrf.mxu1 }
 0x2f3   :  { %1771 = vtanh.f32 %v864_v60  ;;  %v868_v0 = vmul.f32 0.5, %v861_v46  ;;  %v873_v58 = vmul.f32 0.5, %v863_v56  ;;  %v2593_v53 = vld [vmem:[#allocation15_spill] sm:$0xff] }
 0x2f4   :  { %v817_v62 = vpop.f32.mrf.mxu0  ;;  %v858_v47 = vpop.f32.mrf.mxu1 }
 0x2f5   :  { %1773 = vtanh.f32 %v868_v0  ;;  %v2594_v47 = vld [vmem:[#allocation14_spill] sm:$0xff] }
 0x2f6   :  { %1775 = vtanh.f32 %v862_v54 }
 0x2f7   :  { %1777 = vtanh.f32 %v873_v58 }
 0x300   :  { %v1772_v3 = vpop.eup %1771 }
 0x301   :  { %v866_v7 = vmul.f32 0.5, %v1772_v3 }
 0x302   :  { %v1774_v9 = vpop.eup %1773 }
 0x303   :  { %v867_v50 = vadd.f32 0.5, %v866_v7  ;;  %v870_v51 = vmul.f32 0.5, %v1774_v9  ;;  %v1776_v29 = vpop.eup %1775 }
 0x304   :  { %v1778_v4 = vpop.eup %1777 }
 0x305   :  { %v871_v57 = vadd.f32 0.5, %v870_v51  ;;  %v878_v1 = vmul.f32 %v1776_v29, %v867_v50  ;;  %v875_v55 = vmul.f32 0.5, %v1778_v4 }
 0x307   :  { %v877_v5 = vmul.f32 %v871_v57, %v2301_v63  ;;  %v876_v61 = vadd.f32 0.5, %v875_v55 }
 0x309   :  { %v2343_v8 = vadd.f32 %v878_v1, %v877_v5 }
 0x30b   :  { %1779 = vtanh.f32 %v2343_v8 }
 0x318   :  { %v1780_v38 = vpop.eup %1779 }
 0x319   :  { %v881_v2 = vmul.f32 %v1780_v38, %v876_v61 }
 0x31b   :  { %v889_v19 = vpack.c.bf16 %v881_v2, %v881_v2 }
 0x31d   :  { %923 = vmatmul.mubr.bf16.vlgmr.msra.gmra.mxu0 %v889_v19  ;;  %964 = vmatmul.mubr.bf16.vlgmr.msra.gmra.mxu1 %v889_v19 }
 0x31e   :  { %1003 = vmatpush1.bf16.msra.mxu0 %v2013_v12  ;;  %1044 = vmatpush1.bf16.msra.mxu1 %v2015_v13 }
 0x31f   :  { %1004 = vmatprep.subr.bf16.mxu0 %v2018_v14  ;;  %1045 = vmatprep.subr.bf16.mxu1 %v2021_v15 }
 0x320   :  { %1034 = vmatprep.mubr.bf16.mxu0 %v2591_v59  ;;  %1075 = vmatprep.mubr.bf16.mxu1 %v2591_v59 }
 0x322   :  { %1005 = vmatpush1.bf16.msra.mxu0 %v2025_v16  ;;  %1046 = vmatpush1.bf16.msra.mxu1 %v2029_v17 }
 0x323   :  { %1006 = vmatprep.subr.bf16.mxu0 %v2033_v18  ;;  %1047 = vmatprep.subr.bf16.mxu1 %v2040_v20 }
 0x326   :  { %1007 = vmatpush1.bf16.msra.mxu0 %v2042_v21  ;;  %1048 = vmatpush1.bf16.msra.mxu1 %v2046_v22 }
 0x327   :  { %1008 = vmatprep.subr.bf16.mxu0 %v2050_v23  ;;  %1049 = vmatprep.subr.bf16.mxu1 %v2052_v24 }
 0x32a   :  { %1009 = vmatpush1.bf16.msra.mxu0 %v2056_v25  ;;  %1050 = vmatpush1.bf16.msra.mxu1 %v2060_v26 }
 0x32b   :  { %1010 = vmatprep.subr.bf16.mxu0 %v2064_v27  ;;  %1051 = vmatprep.subr.bf16.mxu1 %v2066_v28 }
 0x32e   :  { %1011 = vmatpush1.bf16.msra.mxu0 %v2073_v30  ;;  %1052 = vmatpush1.bf16.msra.mxu1 %v2075_v31 }
 0x32f   :  { %1012 = vmatprep.subr.bf16.mxu0 %v2079_v32  ;;  %1053 = vmatprep.subr.bf16.mxu1 %v2083_v33 }
 0x332   :  { %1013 = vmatpush1.bf16.msra.mxu0 %v2087_v34  ;;  %1054 = vmatpush1.bf16.msra.mxu1 %v2089_v35 }
 0x333   :  { %1014 = vmatprep.subr.bf16.mxu0 %v2093_v36  ;;  %1055 = vmatprep.subr.bf16.mxu1 %v2097_v37 }
 0x336   :  { %1015 = vmatpush1.bf16.msra.mxu0 %v2104_v39  ;;  %1056 = vmatpush1.bf16.msra.mxu1 %v2106_v40 }
 0x337   :  { %1016 = vmatprep.subr.bf16.mxu0 %v2108_v41  ;;  %1057 = vmatprep.subr.bf16.mxu1 %v2110_v42 }
 0x33a   :  { %1017 = vmatpush1.bf16.msra.mxu0 %v2120_v43  ;;  %1058 = vmatpush1.bf16.msra.mxu1 %v2122_v44 }
 0x33b   :  { %1114 = vmatprep.subr.bf16.mxu0 %v2009_v10  ;;  %1155 = vmatprep.subr.bf16.mxu1 %v2011_v11  ;;  %v2595_v10 = vld [vmem:[#allocation16_spill] sm:$0xff] }
 0x3dd   :  { %v924_v63 = vpop.f32.mrf.mxu0  ;;  %v965_v49 = vpop.f32.mrf.mxu1 }
 0x3de   :  { %v972_v45 = vadd.f32 %v924_v63, %v2592_v48  ;;  %v974_v56 = vadd.f32 %v965_v49, %v2594_v47 }
 0x3df   :  { %v926_v60 = vpop.f32.mrf.mxu0  ;;  %v967_v46 = vpop.f32.mrf.mxu1 }
 0x3e0   :  { %v976_v52 = vmul.f32 0.5, %v972_v45  ;;  %v973_v54 = vadd.f32 %v926_v60, %v2593_v53  ;;  %v975_v11 = vadd.f32 %v967_v46, %v2595_v10 }
 0x3e1   :  { %v928_v0 = vpop.f32.mrf.mxu0  ;;  %v969_v62 = vpop.f32.mrf.mxu1 }
 0x3e2   :  { %1781 = vtanh.f32 %v976_v52  ;;  %v980_v58 = vmul.f32 0.5, %v973_v54  ;;  %v985_v9 = vmul.f32 0.5, %v975_v11 }
 0x3e3   :  { %v929_v3 = vpop.f32.mrf.mxu0  ;;  %v970_v7 = vpop.f32.mrf.mxu1 }
 0x3e4   :  { %1783 = vtanh.f32 %v980_v58 }
 0x3e5   :  { %1785 = vtanh.f32 %v974_v56 }
 0x3e6   :  { %1787 = vtanh.f32 %v985_v9  ;;  %v2434_v9 = vld [vmem:[#allocation6 + $0xe0] ss:$16 sps:$4 sm:$0xff]  }
 0x3ef   :  { %v1782_v50 = vpop.eup %1781 }
 0x3f0   :  { %v978_v51 = vmul.f32 0.5, %v1782_v50  ;;  %v2437_v50 = vld [vmem:[#allocation6 + $0xe8] ss:$16 sps:$4 sm:$0xff]  }
 0x3f1   :  { %v1784_v29 = vpop.eup %1783 }
 0x3f2   :  { %v979_v57 = vadd.f32 0.5, %v978_v51  ;;  %v982_v1 = vmul.f32 0.5, %v1784_v29  ;;  %v1786_v5 = vpop.eup %1785  ;;  %v2440_v51 = vld [vmem:[#allocation6 + $0xc4] ss:$16 sps:$4 sm:$0xff]   ;;  %v2443_v29 = vld [vmem:[#allocation6 + $0xcc] ss:$16 sps:$4 sm:$0xff]  }
 0x3f3   :  { %v1788_v2 = vpop.eup %1787 }
 0x3f4   :  { %v983_v4 = vadd.f32 0.5, %v982_v1  ;;  %v990_v55 = vmul.f32 %v1786_v5, %v979_v57  ;;  %v987_v19 = vmul.f32 0.5, %v1788_v2  ;;  %v2448_v57 = vld [vmem:[#allocation6 + $0xc0] ss:$16 sps:$4 sm:$0xff]   ;;  %v2451_v1 = vld [vmem:[#allocation6 + $0xc8] ss:$16 sps:$4 sm:$0xff]  }
 0x3f5   :  { %v2454_v5 = vld [vmem:[#allocation6 + $0xa4] ss:$16 sps:$4 sm:$0xff]   ;;  %v2469_v2 = vld [vmem:[#allocation6 + $0x8c] ss:$16 sps:$4 sm:$0xff]  }
 0x3f6   :  { %v989_v61 = vmul.f32 %v983_v4, %v2343_v8  ;;  %v988_v63 = vadd.f32 0.5, %v987_v19  ;;  %v2457_v4 = vld [vmem:[#allocation6 + $0xac] ss:$16 sps:$4 sm:$0xff]   ;;  %v2472_v19 = vld [vmem:[#allocation6 + $0x80] ss:$16 sps:$4 sm:$0xff]  }
 0x3f8   :  { %v2385_v38 = vadd.f32 %v990_v55, %v989_v61  ;;  %v2460_v55 = vld [vmem:[#allocation6 + $0xa0] ss:$16 sps:$4 sm:$0xff]   ;;  %v2463_v61 = vld [vmem:[#allocation6 + $0xa8] ss:$16 sps:$4 sm:$0xff]  }
 0x3fa   :  { %1789 = vtanh.f32 %v2385_v38 }
 0x407   :  { %v1790_v49 = vpop.eup %1789 }
 0x408   :  { %v993_v48 = vmul.f32 %v1790_v49, %v988_v63  ;;  %v2475_v63 = vld [vmem:[#allocation6 + $0x88] ss:$16 sps:$4 sm:$0xff]   ;;  %v2478_v49 = vld [vmem:[#allocation6 + $0x64] ss:$16 sps:$4 sm:$0xff]  }
 0x40a   :  { %v1001_v45 = vpack.c.bf16 %v993_v48, %v993_v48  ;;  %v2481_v48 = vld [vmem:[#allocation6 + $0x6c] ss:$16 sps:$4 sm:$0xff]  }
 0x40c   :  { %1035 = vmatmul.mubr.bf16.vlgmr.msra.gmra.mxu0 %v1001_v45  ;;  %1076 = vmatmul.mubr.bf16.vlgmr.msra.gmra.mxu1 %v1001_v45  ;;  %v2484_v45 = vld [vmem:[#allocation6 + $0x60] ss:$16 sps:$4 sm:$0xff]  }
 0x40d   :  { %1115 = vmatpush1.bf16.msra.mxu0 %v2013_v12  ;;  %1156 = vmatpush1.bf16.msra.mxu1 %v2015_v13  ;;  %v2420_v12 = vld [vmem:[#allocation6 + $0xe4] ss:$16 sps:$4 sm:$0xff]   ;;  %v2423_v13 = vld [vmem:[#allocation6 + $0xec] ss:$16 sps:$4 sm:$0xff]  }
 0x40e   :  { %1116 = vmatprep.subr.bf16.mxu0 %v2018_v14  ;;  %1157 = vmatprep.subr.bf16.mxu1 %v2021_v15 }
 0x40f   :  { %1146 = vmatprep.mubr.bf16.mxu0 %v2591_v59  ;;  %1187 = vmatprep.mubr.bf16.mxu1 %v2591_v59 }
 0x411   :  { %1117 = vmatpush1.bf16.msra.mxu0 %v2025_v16  ;;  %1158 = vmatpush1.bf16.msra.mxu1 %v2029_v17  ;;  %v2596_v16 = vld [vmem:[#allocation17_spill] sm:$0xff] }
 0x412   :  { %1118 = vmatprep.subr.bf16.mxu0 %v2033_v18  ;;  %1159 = vmatprep.subr.bf16.mxu1 %v2040_v20 }
 0x415   :  { %1119 = vmatpush1.bf16.msra.mxu0 %v2042_v21  ;;  %1160 = vmatpush1.bf16.msra.mxu1 %v2046_v22  ;;  %v2597_v22 = vld [vmem:[#allocation19_spill] sm:$0xff] }
 0x416   :  { %1120 = vmatprep.subr.bf16.mxu0 %v2050_v23  ;;  %1161 = vmatprep.subr.bf16.mxu1 %v2052_v24 }
 0x419   :  { %1121 = vmatpush1.bf16.msra.mxu0 %v2056_v25  ;;  %1162 = vmatpush1.bf16.msra.mxu1 %v2060_v26  ;;  %v2598_v26 = vld [vmem:[#allocation18_spill] sm:$0xff] }
 0x41a   :  { %1122 = vmatprep.subr.bf16.mxu0 %v2064_v27  ;;  %1163 = vmatprep.subr.bf16.mxu1 %v2066_v28 }
 0x41d   :  { %1123 = vmatpush1.bf16.msra.mxu0 %v2073_v30  ;;  %1164 = vmatpush1.bf16.msra.mxu1 %v2075_v31 }
 0x41e   :  { %1124 = vmatprep.subr.bf16.mxu0 %v2079_v32  ;;  %1165 = vmatprep.subr.bf16.mxu1 %v2083_v33  ;;  %v2599_v32 = vld [vmem:[#allocation20_spill] sm:$0xff] }
 0x421   :  { %1125 = vmatpush1.bf16.msra.mxu0 %v2087_v34  ;;  %1166 = vmatpush1.bf16.msra.mxu1 %v2089_v35 }
 0x422   :  { %1126 = vmatprep.subr.bf16.mxu0 %v2093_v36  ;;  %1167 = vmatprep.subr.bf16.mxu1 %v2097_v37 }
 0x425   :  { %1127 = vmatpush1.bf16.msra.mxu0 %v2104_v39  ;;  %1168 = vmatpush1.bf16.msra.mxu1 %v2106_v40 }
 0x426   :  { %1128 = vmatprep.subr.bf16.mxu0 %v2108_v41  ;;  %1169 = vmatprep.subr.bf16.mxu1 %v2110_v42 }
 0x429   :  { %1129 = vmatpush1.bf16.msra.mxu0 %v2120_v43  ;;  %1170 = vmatpush1.bf16.msra.mxu1 %v2122_v44 }
 0x42a   :  { %1226 = vmatprep.subr.bf16.mxu0 %v2420_v12  ;;  %1267 = vmatprep.subr.bf16.mxu1 %v2423_v13 }
 0x4cc   :  { %v1036_v14 = vpop.f32.mrf.mxu0  ;;  %v1077_v15 = vpop.f32.mrf.mxu1 }
 0x4cd   :  { %v1084_v17 = vadd.f32 %v1036_v14, %v2596_v16  ;;  %v1086_v27 = vadd.f32 %v1077_v15, %v2598_v26  ;;  %v2487_v14 = vld [vmem:[#allocation6 + $0x68] ss:$16 sps:$4 sm:$0xff]   ;;  %v2490_v15 = vld [vmem:[#allocation6 + $0x44] ss:$16 sps:$4 sm:$0xff]   ;;  %v2493_v16 = vld [vmem:[#allocation6 + $0x4c] ss:$16 sps:$4 sm:$0xff]  }
 0x4ce   :  { %v1038_v18 = vpop.f32.mrf.mxu0  ;;  %v1079_v20 = vpop.f32.mrf.mxu1 }
 0x4cf   :  { %v1088_v21 = vmul.f32 0.5, %v1084_v17  ;;  %v1085_v23 = vadd.f32 %v1038_v18, %v2597_v22  ;;  %v1087_v33 = vadd.f32 %v1079_v20, %v2599_v32  ;;  %v2496_v17 = vld [vmem:[#allocation6 + $0x40] ss:$16 sps:$4 sm:$0xff]   ;;  %v2499_v18 = vld [vmem:[#allocation6 + $0x48] ss:$16 sps:$4 sm:$0xff]  }
 0x4d0   :  { %v1040_v24 = vpop.f32.mrf.mxu0  ;;  %v1081_v25 = vpop.f32.mrf.mxu1 }
 0x4d1   :  { %1791 = vtanh.f32 %v1088_v21  ;;  %v1092_v28 = vmul.f32 0.5, %v1085_v23  ;;  %v1097_v34 = vmul.f32 0.5, %v1087_v33  ;;  %v2600_v21 = vld [vmem:[#allocation21_spill] sm:$0xff] }
 0x4d2   :  { %v1041_v30 = vpop.f32.mrf.mxu0  ;;  %v1082_v31 = vpop.f32.mrf.mxu1 }
 0x4d3   :  { %1793 = vtanh.f32 %v1092_v28 }
 0x4d4   :  { %1795 = vtanh.f32 %v1086_v27 }
 0x4d5   :  { %1797 = vtanh.f32 %v1097_v34 }
 0x4de   :  { %v1792_v35 = vpop.eup %1791 }
 0x4df   :  { %v1090_v8 = vmul.f32 0.5, %v1792_v35 }
 0x4e0   :  { %v1794_v60 = vpop.eup %1793 }
 0x4e1   :  { %v1091_v46 = vadd.f32 0.5, %v1090_v8  ;;  %v1094_v52 = vmul.f32 0.5, %v1794_v60  ;;  %v1796_v53 = vpop.eup %1795 }
 0x4e2   :  { %v1798_v56 = vpop.eup %1797 }
 0x4e3   :  { %v1095_v54 = vadd.f32 0.5, %v1094_v52  ;;  %v1102_v0 = vmul.f32 %v1796_v53, %v1091_v46  ;;  %v1099_v58 = vmul.f32 0.5, %v1798_v56 }
 0x4e5   :  { %v1101_v62 = vmul.f32 %v1095_v54, %v2385_v38  ;;  %v1100_v3 = vadd.f32 0.5, %v1099_v58  ;;  %v2466_v38 = vld [vmem:[#allocation6 + $0x84] ss:$16 sps:$4 sm:$0xff]  }
 0x4e7   :  { %v2431_v47 = vadd.f32 %v1102_v0, %v1101_v62 }
 0x4e9   :  { %1799 = vtanh.f32 %v2431_v47 }
 0x4f6   :  { %v1800_v7 = vpop.eup %1799 }
 0x4f7   :  { %v1105_v10 = vmul.f32 %v1800_v7, %v1100_v3  ;;  %v1857_v3 = vld [vmem:[#allocation6 + $0x20] ss:$16 sps:$4 sm:$0xff]   ;;  %v1858_v7 = vld [vmem:[#allocation6 + $0x28] ss:$16 sps:$4 sm:$0xff]  }
 0x4f9   :  { %v1113_v11 = vpack.c.bf16 %v1105_v10, %v1105_v10  ;;  %v1859_v10 = vld [vmem:[#allocation6 + $0x4] ss:$16 sps:$4 sm:$0xff]  }
 0x4fb   :  { %1147 = vmatmul.mubr.bf16.vlgmr.msra.gmra.mxu0 %v1113_v11  ;;  %1188 = vmatmul.mubr.bf16.vlgmr.msra.gmra.mxu1 %v1113_v11  ;;  %v1860_v11 = vld [vmem:[#allocation6 + $0xc] ss:$16 sps:$4 sm:$0xff]  }
 0x4fc   :  { %1227 = vmatpush1.bf16.msra.mxu0 %v2434_v9  ;;  %1268 = vmatpush1.bf16.msra.mxu1 %v2437_v50 }
 0x4fd   :  { %1228 = vmatprep.subr.bf16.mxu0 %v2440_v51  ;;  %1269 = vmatprep.subr.bf16.mxu1 %v2443_v29 }
 0x4fe   :  { %1258 = vmatprep.mubr.bf16.mxu0 %v2591_v59  ;;  %1299 = vmatprep.mubr.bf16.mxu1 %v2591_v59 }
 0x500   :  { %1229 = vmatpush1.bf16.msra.mxu0 %v2448_v57  ;;  %1270 = vmatpush1.bf16.msra.mxu1 %v2451_v1 }
 0x501   :  { %1230 = vmatprep.subr.bf16.mxu0 %v2454_v5  ;;  %1271 = vmatprep.subr.bf16.mxu1 %v2457_v4 }
 0x504   :  { %1231 = vmatpush1.bf16.msra.mxu0 %v2460_v55  ;;  %1272 = vmatpush1.bf16.msra.mxu1 %v2463_v61 }
 0x505   :  { %1232 = vmatprep.subr.bf16.mxu0 %v2466_v38  ;;  %1273 = vmatprep.subr.bf16.mxu1 %v2469_v2 }
 0x508   :  { %1233 = vmatpush1.bf16.msra.mxu0 %v2472_v19  ;;  %1274 = vmatpush1.bf16.msra.mxu1 %v2475_v63 }
 0x509   :  { %1234 = vmatprep.subr.bf16.mxu0 %v2478_v49  ;;  %1275 = vmatprep.subr.bf16.mxu1 %v2481_v48 }
 0x50c   :  { %1235 = vmatpush1.bf16.msra.mxu0 %v2484_v45  ;;  %1276 = vmatpush1.bf16.msra.mxu1 %v2487_v14 }
 0x50d   :  { %1236 = vmatprep.subr.bf16.mxu0 %v2490_v15  ;;  %1277 = vmatprep.subr.bf16.mxu1 %v2493_v16 }
 0x510   :  { %1237 = vmatpush1.bf16.msra.mxu0 %v2496_v17  ;;  %1278 = vmatpush1.bf16.msra.mxu1 %v2499_v18 }
 0x511   :  { %1238 = vmatprep.subr.bf16.mxu0 %v2093_v36  ;;  %1279 = vmatprep.subr.bf16.mxu1 %v2097_v37 }
 0x514   :  { %1239 = vmatpush1.bf16.msra.mxu0 %v2104_v39  ;;  %1280 = vmatpush1.bf16.msra.mxu1 %v2106_v40  ;;  %v2601_v40 = vld [vmem:[#allocation23_spill] sm:$0xff] }
 0x515   :  { %1240 = vmatprep.subr.bf16.mxu0 %v2108_v41  ;;  %1281 = vmatprep.subr.bf16.mxu1 %v2110_v42  ;;  %v2602_v42 = vld [vmem:[#allocation22_spill] sm:$0xff] }
 0x518   :  { %1241 = vmatpush1.bf16.msra.mxu0 %v2120_v43  ;;  %1282 = vmatpush1.bf16.msra.mxu1 %v2122_v44 }
 0x519   :  { %1338 = vmatprep.subr.bf16.mxu0 %v2420_v12  ;;  %1379 = vmatprep.subr.bf16.mxu1 %v2423_v13  ;;  %v2603_v12 = vld [vmem:[#allocation24_spill] sm:$0xff] }
 0x5bb   :  { %v1148_v20 = vpop.f32.mrf.mxu0  ;;  %v1189_v36 = vpop.f32.mrf.mxu1 }
 0x5bc   :  { %v1196_v37 = vadd.f32 %v1148_v20, %v2600_v21  ;;  %v1198_v43 = vadd.f32 %v1189_v36, %v2602_v42 }
 0x5bd   :  { %v1150_v22 = vpop.f32.mrf.mxu0  ;;  %v1191_v39 = vpop.f32.mrf.mxu1 }
 0x5be   :  { %v1200_v23 = vmul.f32 0.5, %v1196_v37  ;;  %v1197_v24 = vadd.f32 %v1150_v22, %v2601_v40  ;;  %v1199_v13 = vadd.f32 %v1191_v39, %v2603_v12  ;;  %v1957_v12 = vmov 0.0  }
 0x5bf   :  { %v1152_v41 = vpop.f32.mrf.mxu0  ;;  %v1193_v25 = vpop.f32.mrf.mxu1 }
 0x5c0   :  { %1801 = vtanh.f32 %v1200_v23  ;;  %v1204_v26 = vmul.f32 0.5, %v1197_v24  ;;  %v1209_v28 = vmul.f32 0.5, %v1199_v13  ;;  %v1744_v13 = vld [vmem:[#allocation8 + $0x30] sm:$0xff]  }
 0x5c1   :  { %v1153_v44 = vpop.f32.mrf.mxu0  ;;  %v1194_v27 = vpop.f32.mrf.mxu1 }
 0x5c2   :  { %1803 = vtanh.f32 %v1204_v26  ;;  %v1743_v27 = vld [vmem:[#allocation8 + $0x38] sm:$0xff]  }
 0x5c3   :  { %1805 = vtanh.f32 %v1198_v43 }
 0x5c4   :  { %1807 = vtanh.f32 %v1209_v28  ;;  %v1745_v28 = vld [vmem:[#allocation8 + $0x28] sm:$0xff]  }
 0x5cd   :  { %v1802_v30 = vpop.eup %1801 }
 0x5ce   :  { %v1202_v31 = vmul.f32 0.5, %v1802_v30  ;;  %v1746_v30 = vld [vmem:[#allocation8 + $0x20] sm:$0xff]  }
 0x5cf   :  { %v1804_v32 = vpop.eup %1803 }
 0x5d0   :  { %v1203_v33 = vadd.f32 0.5, %v1202_v31  ;;  %v1206_v34 = vmul.f32 0.5, %v1804_v32  ;;  %v1806_v35 = vpop.eup %1805  ;;  %v1747_v31 = vld [vmem:[#allocation8 + $0x18] sm:$0xff]   ;;  %v1748_v32 = vld [vmem:[#allocation8 + $0x10] sm:$0xff]  }
 0x5d1   :  { %v1808_v53 = vpop.eup %1807 }
 0x5d2   :  { %v1207_v8 = vadd.f32 0.5, %v1206_v34  ;;  %v1214_v60 = vmul.f32 %v1806_v35, %v1203_v33  ;;  %v1211_v54 = vmul.f32 0.5, %v1808_v53  ;;  %v1749_v33 = vld [vmem:[#allocation8 + $0x8] sm:$0xff]   ;;  %v1750_v34 = vld [vmem:[#allocation8] sm:$0xff]  }
 0x5d4   :  { %v1213_v46 = vmul.f32 %v1207_v8, %v2431_v47  ;;  %v1212_v0 = vadd.f32 0.5, %v1211_v54  ;;  %v1856_v47 = vld [vmem:[#allocation6 + $0x2c] ss:$16 sps:$4 sm:$0xff]  }
 0x5d6   :  { %v2517_v52 = vadd.f32 %v1214_v60, %v1213_v46  ;;  %v2608_v60 = vld [vmem:[#allocation29_spill] sm:$0xff] }
 0x5d8   :  { %1809 = vtanh.f32 %v2517_v52 }
 0x5e5   :  { %v1810_v62 = vpop.eup %1809 }
 0x5e6   :  { %v1217_v56 = vmul.f32 %v1810_v62, %v1212_v0 }
 0x5e8   :  { %v1225_v58 = vpack.c.bf16 %v1217_v56, %v1217_v56 }
 0x5ea   :  { %1259 = vmatmul.mubr.bf16.vlgmr.msra.gmra.mxu0 %v1225_v58  ;;  %1300 = vmatmul.mubr.bf16.vlgmr.msra.gmra.mxu1 %v1225_v58  ;;  %v2609_v58 = vld [vmem:[#allocation30_spill] sm:$0xff] }
 0x5eb   :  { %1339 = vmatpush1.bf16.msra.mxu0 %v2434_v9  ;;  %1380 = vmatpush1.bf16.msra.mxu1 %v2437_v50  ;;  %v1861_v9 = vld [vmem:[#allocation6] ss:$16 sps:$4 sm:$0xff]   ;;  %v1862_v50 = vld [vmem:[#allocation6 + $0x8] ss:$16 sps:$4 sm:$0xff]  }
 0x5ec   :  { %1340 = vmatprep.subr.bf16.mxu0 %v2440_v51  ;;  %1381 = vmatprep.subr.bf16.mxu1 %v2443_v29 }
 0x5ed   :  { %1370 = vmatprep.mubr.bf16.mxu0 %v2591_v59  ;;  %1411 = vmatprep.mubr.bf16.mxu1 %v2591_v59  ;;  %v1855_v59 = vld [vmem:[#allocation6 + $0x24] ss:$16 sps:$4 sm:$0xff]  }
 0x5ef   :  { %1341 = vmatpush1.bf16.msra.mxu0 %v2448_v57  ;;  %1382 = vmatpush1.bf16.msra.mxu1 %v2451_v1  ;;  %v2604_v57 = vld [vmem:[#allocation25_spill] sm:$0xff] }
 0x5f0   :  { %1342 = vmatprep.subr.bf16.mxu0 %v2454_v5  ;;  %1383 = vmatprep.subr.bf16.mxu1 %v2457_v4 }
 0x5f3   :  { %1343 = vmatpush1.bf16.msra.mxu0 %v2460_v55  ;;  %1384 = vmatpush1.bf16.msra.mxu1 %v2463_v61  ;;  %v2605_v61 = vld [vmem:[#allocation27_spill] sm:$0xff] }
 0x5f4   :  { %1344 = vmatprep.subr.bf16.mxu0 %v2466_v38  ;;  %1385 = vmatprep.subr.bf16.mxu1 %v2469_v2 }
 0x5f7   :  { %1345 = vmatpush1.bf16.msra.mxu0 %v2472_v19  ;;  %1386 = vmatpush1.bf16.msra.mxu1 %v2475_v63  ;;  %v2606_v63 = vld [vmem:[#allocation26_spill] sm:$0xff] }
 0x5f8   :  { %1346 = vmatprep.subr.bf16.mxu0 %v2478_v49  ;;  %1387 = vmatprep.subr.bf16.mxu1 %v2481_v48 }
 0x5fb   :  { %1347 = vmatpush1.bf16.msra.mxu0 %v2484_v45  ;;  %1388 = vmatpush1.bf16.msra.mxu1 %v2487_v14 }
 0x5fc   :  { %1348 = vmatprep.subr.bf16.mxu0 %v2490_v15  ;;  %1389 = vmatprep.subr.bf16.mxu1 %v2493_v16  ;;  %v2607_v15 = vld [vmem:[#allocation28_spill] sm:$0xff] }
 0x5ff   :  { %1349 = vmatpush1.bf16.msra.mxu0 %v2496_v17  ;;  %1390 = vmatpush1.bf16.msra.mxu1 %v2499_v18 }
 0x600   :  { %1350 = vmatprep.subr.bf16.mxu0 %v1855_v59  ;;  %1391 = vmatprep.subr.bf16.mxu1 %v1856_v47 }
 0x603   :  { %1351 = vmatpush1.bf16.msra.mxu0 %v1857_v3  ;;  %1392 = vmatpush1.bf16.msra.mxu1 %v1858_v7 }
 0x604   :  { %1352 = vmatprep.subr.bf16.mxu0 %v1859_v10  ;;  %1393 = vmatprep.subr.bf16.mxu1 %v1860_v11  ;;  %v2610_v10 = vld [vmem:[#allocation31_spill] sm:$0xff] }
 0x607   :  { %1353 = vmatpush1.bf16.msra.mxu0 %v1861_v9  ;;  %1394 = vmatpush1.bf16.msra.mxu1 %v1862_v50 }
 0x608   :  { %1648 = vmatprep.subr.bf16.mxu0 %v1957_v12 }
 0x6aa   :  { %v1260_v51 = vpop.f32.mrf.mxu0  ;;  %v1301_v29 = vpop.f32.mrf.mxu1 }
 0x6ab   :  { %v1308_v1 = vadd.f32 %v1260_v51, %v2604_v57  ;;  %v1310_v49 = vadd.f32 %v1301_v29, %v2606_v63 }
 0x6ac   :  { %v1262_v5 = vpop.f32.mrf.mxu0  ;;  %v1303_v4 = vpop.f32.mrf.mxu1 }
 0x6ad   :  { %v1312_v55 = vmul.f32 0.5, %v1308_v1  ;;  %v1309_v38 = vadd.f32 %v1262_v5, %v2605_v61  ;;  %v1311_v16 = vadd.f32 %v1303_v4, %v2607_v15 }
 0x6ae   :  { %v1264_v2 = vpop.f32.mrf.mxu0  ;;  %v1305_v19 = vpop.f32.mrf.mxu1 }
 0x6af   :  { %1811 = vtanh.f32 %v1312_v55  ;;  %v1316_v48 = vmul.f32 0.5, %v1309_v38  ;;  %v1321_v17 = vmul.f32 0.5, %v1311_v16 }
 0x6b0   :  { %v1265_v45 = vpop.f32.mrf.mxu0  ;;  %v1306_v14 = vpop.f32.mrf.mxu1 }
 0x6b1   :  { %1813 = vtanh.f32 %v1316_v48  ;;  %v1630_v45 = vld [vmem:[%s2568_s5] ss:$0 sm:$0xff] }
 0x6b2   :  { %1815 = vtanh.f32 %v1310_v49 }
 0x6b3   :  { %1817 = vtanh.f32 %v1321_v17 }
 0x6bc   :  { %v1812_v18 = vpop.eup %1811 }
 0x6bd   :  { %v1314_v20 = vmul.f32 0.5, %v1812_v18 }
 0x6be   :  { %v1814_v36 = vpop.eup %1813 }
 0x6bf   :  { %v1315_v21 = vadd.f32 0.5, %v1314_v20  ;;  %v1318_v37 = vmul.f32 0.5, %v1814_v36  ;;  %v1816_v22 = vpop.eup %1815 }
 0x6c0   :  { %v1818_v41 = vpop.eup %1817 }
 0x6c1   :  { %v1319_v39 = vadd.f32 0.5, %v1318_v37  ;;  %v1326_v23 = vmul.f32 %v1816_v22, %v1315_v21  ;;  %v1323_v25 = vmul.f32 0.5, %v1818_v41 }
 0x6c3   :  { %v1325_v40 = vmul.f32 %v1319_v39, %v2517_v52  ;;  %v1324_v42 = vadd.f32 0.5, %v1323_v25 }
 0x6c5   :  { %v2549_v24 = vadd.f32 %v1326_v23, %v1325_v40 }
 0x6c7   :  { %1819 = vtanh.f32 %v2549_v24 }
 0x6d4   :  { %v1820_v43 = vpop.eup %1819 }
 0x6d5   :  { %v1329_v26 = vmul.f32 %v1820_v43, %v1324_v42 }
 0x6d7   :  { %v1337_v44 = vpack.c.bf16 %v1329_v26, %v1329_v26 }
 0x6d9   :  { %1371 = vmatmul.mubr.bf16.vlgmr.msra.gmra.mxu0 %v1337_v44  ;;  %1412 = vmatmul.mubr.bf16.vlgmr.msra.gmra.mxu1 %v1337_v44 }
 0x6da   :  { %1649 = vmatpush3.bf16.msra.mxu0 %v1743_v27  ;;  %1664 = vmatprep.mubr.msk.bf16.mxu0 %vm1958_vm1, %v1957_v12 }
 0x6db   :  { %1650 = vmatprep.subr.bf16.mxu0 %v1957_v12 }
 0x6de   :  { %1651 = vmatpush3.bf16.msra.mxu0 %v1744_v13 }
 0x6df   :  { %1652 = vmatprep.subr.bf16.mxu0 %v1957_v12 }
 0x6e2   :  { %1653 = vmatpush3.bf16.msra.mxu0 %v1745_v28 }
 0x6e3   :  { %1654 = vmatprep.subr.bf16.mxu0 %v1957_v12 }
 0x6e6   :  { %1655 = vmatpush3.bf16.msra.mxu0 %v1746_v30 }
 0x6e7   :  { %1656 = vmatprep.subr.bf16.mxu0 %v1957_v12 }
 0x6ea   :  { %1657 = vmatpush3.bf16.msra.mxu0 %v1747_v31 }
 0x6eb   :  { %1658 = vmatprep.subr.bf16.mxu0 %v1957_v12 }
 0x6ee   :  { %1659 = vmatpush3.bf16.msra.mxu0 %v1748_v32 }
 0x6ef   :  { %1660 = vmatprep.subr.bf16.mxu0 %v1957_v12 }
 0x6f2   :  { %1661 = vmatpush3.bf16.msra.mxu0 %v1749_v33 }
 0x6f3   :  { %1662 = vmatprep.subr.bf16.mxu0 %v1957_v12 }
 0x6f6   :  { %1663 = vmatpush3.bf16.msra.mxu0 %v1750_v34 }
 0x799   :  { %v1372_v35 = vpop.f32.mrf.mxu0  ;;  %v1413_v8 = vpop.f32.mrf.mxu1 }
 0x79a   :  { %v1420_v46 = vadd.f32 %v1372_v35, %v2608_v60  ;;  %v1422_v59 = vadd.f32 %v1413_v8, %v2609_v58 }
 0x79b   :  { %v1374_v52 = vpop.f32.mrf.mxu0  ;;  %v1415_v53 = vpop.f32.mrf.mxu1 }
 0x79c   :  { %v1424_v54 = vmul.f32 0.5, %v1420_v46  ;;  %v1421_v0 = vadd.f32 %v1374_v52, %v2249_v6  ;;  %v1423_v11 = vadd.f32 %v1415_v53, %v2610_v10 }
 0x79d   :  { %v1376_v62 = vpop.f32.mrf.mxu0  ;;  %v1417_v56 = vpop.f32.mrf.mxu1 }
 0x79e   :  { %1821 = vtanh.f32 %v1424_v54  ;;  %v1428_v47 = vmul.f32 0.5, %v1421_v0  ;;  %v1433_v9 = vmul.f32 0.5, %v1423_v11 }
 0x79f   :  { %v1377_v3 = vpop.f32.mrf.mxu0  ;;  %v1418_v7 = vpop.f32.mrf.mxu1 }
 0x7a0   :  { %1823 = vtanh.f32 %v1428_v47 }
 0x7a1   :  { %1825 = vtanh.f32 %v1422_v59 }
 0x7a2   :  { %1827 = vtanh.f32 %v1433_v9 }
 0x7ab   :  { %v1822_v50 = vpop.eup %1821 }
 0x7ac   :  { %v1426_v51 = vmul.f32 0.5, %v1822_v50 }
 0x7ad   :  { %v1824_v29 = vpop.eup %1823 }
 0x7ae   :  { %v1427_v57 = vadd.f32 0.5, %v1426_v51  ;;  %v1430_v1 = vmul.f32 0.5, %v1824_v29  ;;  %v1826_v6 = vpop.eup %1825 }
 0x7af   :  { %v1828_v38 = vpop.eup %1827 }
 0x7b0   :  { %v1431_v5 = vadd.f32 0.5, %v1430_v1  ;;  %v1438_v4 = vmul.f32 %v1826_v6, %v1427_v57  ;;  %v1435_v2 = vmul.f32 0.5, %v1828_v38 }
 0x7b2   :  { %v1437_v55 = vmul.f32 %v1431_v5, %v2549_v24  ;;  %v1436_v19 = vadd.f32 0.5, %v1435_v2 }
 0x7b4   :  { %v1439_v61 = vadd.f32 %v1438_v4, %v1437_v55 }
 0x7b6   :  { %1829 = vtanh.f32 %v1439_v61 }
 0x7c3   :  { %v1830_v63 = vpop.eup %1829 }
 0x7c4   :  { %v1441_v49 = vmul.f32 %v1830_v63, %v1436_v19 }
 0x7c6   :  { %v1442_v48 = vpack.c.bf16 %v1441_v49, %v1441_v49 }
 0x7c8   :  { %1665 = vmatmul.mubr.bf16.vlgmr.msra.gmra.mxu0 %v1442_v48 }
 0x888   :  { %v1548_v14 = vpop.f32.mrf.mxu0 }
 0x889   :  { %v1549_v15 = vadd.f32 %v1630_v45, %v1548_v14 }
 0x88a   :  { %v1666_v16 = vpop.f32.mrf.mxu0 }
 0x88b   :  { %1554 = vst [vmem:[#allocation9] sm:$0xff] %v1549_v15 }
 0x88c   :  { %v1551_v17 = vpop.f32.mrf.mxu0 }
 0x88d   :  { %1934 = shalt.err (!%p1931_p5)
}
 0x88e   :  { %1564 = dma.vmem_to_hbm [thread:$0]  %s1562_s24, 128, %s2569_s6, [#allocation5]   ;;  %v1667_v18 = vpop.f32.mrf.mxu0 }
 0x88f   :  { %1947 = dma.done.wait [#allocation5], 128  }
 0x890   :  { %1948 = vsyncadd [#allocation5], 4294967168 }
 0x891   :  { %1568 = vsyncpa [#allocation4], 1 }
 0x892   :  { %1569 = vsyncpa [#allocation7], 1 }
 0x893   :  { %1570 = vsyncpa [#allocation5], 1 }

</bundles_post_ra>
